<compile_context>
chip_gen: v6e
topology: v6e:2x2x1
jax: 0.10.0
libtpu: 0.0.40
codegen_flags: <defaults>
</compile_context>

<pallas_src>
import functools
import math

import jax
import jax.numpy as jnp
import numpy as np
from jax.experimental import pallas as pl
from jax.experimental.pallas import tpu as pltpu

_MASK_VALUE = -1e30              # finite "masked" score (no -inf -> no NaN risk)
_TILE_CANDS = (512, 256, 128, 64, 32, 16, 8)


@functools.lru_cache(maxsize=None)
def _vmem_budget_bytes():
    """Generation-aware VMEM budget: ~75% of physical VMEM (~48 MiB on v7x,
    ~96 MiB on v5e/v6e) so each chip runs its largest safe tiles."""
    try:
        cap = int(pltpu.get_tpu_info().vmem_capacity_bytes)
    except Exception:
        cap = 64 * 1024 * 1024          # conservative (v7x-sized) fallback
    return max(32 * 1024 * 1024, min(int(cap * 3 // 4), 112 * 1024 * 1024))


def _divisor_tiles(dim, cands=_TILE_CANDS):
    out = [c for c in cands if c <= dim and dim % c == 0]
    return out if out else [dim]


def _pick_tile(dim, candidates=_TILE_CANDS):
    for c in candidates:
        if c <= dim and dim % c == 0:
            return c
    return dim


# ------------------- kernel 1: fused RMSNorm + matmul (QKV) ------------------

def _rms_matmul_kernel(x_ref, scale_ref, w_ref, o_ref, acc_ref, inv_ref,
                       *, eps, tk):
    k = pl.program_id(2)

    @pl.when(k == 0)
    def _init():
        x = x_ref[...].astype(jnp.float32)
        inv_ref[...] = jax.lax.rsqrt(jnp.mean(x * x, axis=-1, keepdims=True) + eps)
        acc_ref[...] = jnp.zeros_like(acc_ref)

    ks = pl.multiple_of(k * tk, tk)
    xk = x_ref[:, pl.ds(ks, tk)].astype(jnp.float32)
    sk = scale_ref[:, pl.ds(ks, tk)].astype(jnp.float32)
    xn = (xk * inv_ref[...]) * sk
    acc_ref[...] += jnp.dot(xn.astype(w_ref.dtype), w_ref[...],
                            preferred_element_type=jnp.float32)

    @pl.when(k == pl.num_programs(2) - 1)
    def _fin():
        o_ref[...] = acc_ref[...].astype(o_ref.dtype)


def _choose_rms_matmul_tiles(M, K, N, dsz, budget):
    # Prefer the largest tm (weights are re-streamed once per M tile), then tn,
    # then tk, under the per-generation VMEM budget.
    for tm in _divisor_tiles(M):
        for tn in _divisor_tiles(N):
            for tk in _divisor_tiles(K, (1024,) + _TILE_CANDS):
                need = (2 * tm * K * dsz        # x block (resident; count 2 bufs)
                        + 2 * tk * tn * dsz     # w tiles (double-buffered)
                        + 2 * tm * tn * dsz     # out tiles
                        + tm * tn * 4           # f32 accumulator
                        + 2 * K * dsz + tm * 4)  # scale row + inv-rms scratch
                if need <= budget:
                    return tm, tn, tk
    return _divisor_tiles(M)[-1], _divisor_tiles(N)[-1], _divisor_tiles(K)[-1]


def rms_matmul(x2d, scale, w, eps=1e-5):
    """out = rmsnorm(x2d; scale) @ w.   x2d: (M, K), w: (K, N)."""
    M, K = x2d.shape
    K2, N = w.shape
    assert K == K2
    budget = _vmem_budget_bytes()
    dsz = x2d.dtype.itemsize
    tm, tn, tk = _choose_rms_matmul_tiles(M, K, N, dsz, budget)
    return pl.pallas_call(
        functools.partial(_rms_matmul_kernel, eps=eps, tk=tk),
        out_shape=jax.ShapeDtypeStruct((M, N), x2d.dtype),
        grid=(M // tm, N // tn, K // tk),
        in_specs=[
            pl.BlockSpec((tm, K), lambda m, n, k: (m, 0)),
            pl.BlockSpec((1, K), lambda m, n, k: (0, 0)),
            pl.BlockSpec((tk, tn), lambda m, n, k: (k, n)),
        ],
        out_specs=pl.BlockSpec((tm, tn), lambda m, n, k: (m, n)),
        scratch_shapes=[pltpu.VMEM((tm, tn), jnp.float32),
                        pltpu.VMEM((tm, 1), jnp.float32)],
        compiler_params=pltpu.CompilerParams(
            dimension_semantics=("parallel", "parallel", "arbitrary"),
            vmem_limit_bytes=budget),
    )(x2d, scale.reshape(1, K), w)


# ----------------- kernel 2: matmul with fused residual add ------------------

def _matmul_residual_kernel(y_ref, w_ref, r_ref, o_ref, acc_ref):
    k = pl.program_id(2)

    @pl.when(k == 0)
    def _init():
        acc_ref[...] = jnp.zeros_like(acc_ref)

    acc_ref[...] += jnp.dot(y_ref[...], w_ref[...],
                            preferred_element_type=jnp.float32)

    @pl.when(k == pl.num_programs(2) - 1)
    def _fin():
        o_ref[...] = (r_ref[...].astype(jnp.float32)
                      + acc_ref[...]).astype(o_ref.dtype)


def _choose_matmul_tiles(M, K, N, dsz, budget):
    for tm in _divisor_tiles(M):
        for tn in _divisor_tiles(N):
            for tk in _divisor_tiles(K, (1024,) + _TILE_CANDS):
                need = (2 * tm * tk * dsz + 2 * tk * tn * dsz
                        + 4 * tm * tn * dsz      # resid + out tiles
                        + tm * tn * 4)           # f32 accumulator
                if need <= budget:
                    return tm, tn, tk
    return _divisor_tiles(M)[-1], _divisor_tiles(N)[-1], _divisor_tiles(K)[-1]


def matmul_residual(y2d, w, resid2d):
    """out = resid2d + y2d @ w."""
    M, K = y2d.shape
    _, N = w.shape
    budget = _vmem_budget_bytes()
    dsz = y2d.dtype.itemsize
    tm, tn, tk = _choose_matmul_tiles(M, K, N, dsz, budget)
    return pl.pallas_call(
        _matmul_residual_kernel,
        out_shape=jax.ShapeDtypeStruct((M, N), resid2d.dtype),
        grid=(M // tm, N // tn, K // tk),
        in_specs=[
            pl.BlockSpec((tm, tk), lambda m, n, k: (m, k)),
            pl.BlockSpec((tk, tn), lambda m, n, k: (k, n)),
            pl.BlockSpec((tm, tn), lambda m, n, k: (m, n)),
        ],
        out_specs=pl.BlockSpec((tm, tn), lambda m, n, k: (m, n)),
        scratch_shapes=[pltpu.VMEM((tm, tn), jnp.float32)],
        compiler_params=pltpu.CompilerParams(
            dimension_semantics=("parallel", "parallel", "arbitrary"),
            vmem_limit_bytes=budget),
    )(y2d, w, resid2d)


# -------------- kernel 3: flash attention with fused RoPE + mask -------------

def _flash_attn_kernel(q_ref, k_ref, v_ref, cq_ref, sq_ref, ck_ref, sk_ref,
                       o_ref, q_sc, m_sc, l_sc, acc_sc, *, scale, tq, tkv):
    qi = pl.program_id(2)
    ki = pl.program_id(3)
    nk = pl.num_programs(3)
    hd = q_ref.shape[-1]
    half = hd // 2

    # rotate-half RoPE (q/k weight columns were de-interleaved at load time;
    # the sin cache already carries the [-sin, +sin] sign pattern).
    def rope(x, cosf, sinf):
        return x * cosf + pltpu.roll(x, half, axis=1) * sinf

    @pl.when(ki == 0)
    def _init():
        m_sc[...] = jnp.full(m_sc.shape, -jnp.inf, dtype=m_sc.dtype)
        l_sc[...] = jnp.zeros_like(l_sc)
        acc_sc[...] = jnp.zeros_like(acc_sc)
        q = rope(q_ref[0].astype(jnp.float32),
                 cq_ref[...].astype(jnp.float32), sq_ref[...].astype(jnp.float32))
        q_sc[...] = (q * scale).astype(q_sc.dtype)   # RoPE + scale once per q tile

    def scores():
        k = rope(k_ref[0].astype(jnp.float32),
                 ck_ref[...].astype(jnp.float32), sk_ref[...].astype(jnp.float32))
        # NT contraction (no transposed K-tile copy); activation-dtype MXU inputs.
        return jax.lax.dot_general(
            q_sc[...], k.astype(k_ref.dtype),
            dimension_numbers=(((1,), (1,)), ((), ())),
            preferred_element_type=jnp.float32)

    def accumulate(s):
        v = v_ref[0]
        m_prev = m_sc[...]
        m_new = jnp.maximum(m_prev, jnp.max(s, axis=-1, keepdims=True))
        alpha = jnp.exp(m_prev - m_new)
        p = jnp.exp(s - m_new)
        l_sc[...] = alpha * l_sc[...] + jnp.sum(p, axis=-1, keepdims=True)
        acc_sc[...] = alpha * acc_sc[...] + jnp.dot(
            p.astype(v.dtype), v, preferred_element_type=jnp.float32)
        m_sc[...] = m_new

    # tq == tkv, so block-level causality is exactly ki <= qi.
    @pl.when(ki < qi)          # fully-unmasked past block: no iota / mask work
    def _full():
        accumulate(scores())

    @pl.when(ki == qi)         # diagonal block: build the causal mask in-kernel
    def _diag():
        rows = jax.lax.broadcasted_iota(jnp.int32, (tq, tkv), 0)
        cols = jax.lax.broadcasted_iota(jnp.int32, (tq, tkv), 1)
        accumulate(jnp.where(rows >= cols, scores(), _MASK_VALUE))

    @pl.when(ki == nk - 1)
    def _fin():
        o_ref[0] = (acc_sc[...] * pl.reciprocal(l_sc[...], approx=True)
                    ).astype(o_ref.dtype)


def flash_attention(qkv3, cos_f, sin_f, *, n_head, scale):
    """qkv3: (B, T, 3C) packed [q|k|v]; returns attention output in (B, T, C)."""
    B, T, C3 = qkv3.shape
    C = C3 // 3
    H = n_head
    hd = C // H
    tq = _pick_tile(T)          # includes 512-wide tiles for long T
    tkv = tq
    budget = _vmem_budget_bytes()

    # k/v (and their cos/sin) index_maps are clamped to the causal range so the
    # pipeline never re-fetches KV blocks that are entirely masked out.
    q_spec = pl.BlockSpec((1, tq, hd), lambda b, h, qi, ki: (b, qi, h))
    k_spec = pl.BlockSpec((1, tkv, hd),
                          lambda b, h, qi, ki: (b, jnp.minimum(ki, qi), H + h))
    v_spec = pl.BlockSpec((1, tkv, hd),
                          lambda b, h, qi, ki: (b, jnp.minimum(ki, qi), 2 * H + h))
    cq_spec = pl.BlockSpec((tq, hd), lambda b, h, qi, ki: (qi, 0))
    ck_spec = pl.BlockSpec((tkv, hd),
                           lambda b, h, qi, ki: (jnp.minimum(ki, qi), 0))

    return pl.pallas_call(
        functools.partial(_flash_attn_kernel, scale=scale, tq=tq, tkv=tkv),
        out_shape=jax.ShapeDtypeStruct((B, T, C), qkv3.dtype),
        grid=(B, H, T // tq, T // tkv),
        in_specs=[q_spec, k_spec, v_spec, cq_spec, cq_spec, ck_spec, ck_spec],
        out_specs=pl.BlockSpec((1, tq, hd), lambda b, h, qi, ki: (b, qi, h)),
        scratch_shapes=[
            pltpu.VMEM((tq, hd), qkv3.dtype),     # rope(q)*scale, per q tile
            pltpu.VMEM((tq, 1), jnp.float32),     # running max
            pltpu.VMEM((tq, 1), jnp.float32),     # running denom
            pltpu.VMEM((tq, hd), jnp.float32),    # output accumulator
        ],
        compiler_params=pltpu.CompilerParams(
            dimension_semantics=("parallel", "parallel", "parallel", "arbitrary"),
            vmem_limit_bytes=budget),
    )(qkv3, qkv3, qkv3, cos_f, sin_f, cos_f, sin_f)


# -------- kernel 4: fused RMSNorm + SwiGLU MLP + residual (hidden-tiled) -----

def _fused_mlp_kernel(x_ref, scale_ref, w12_ref, w3_ref, o_ref, acc_ref, xn_ref,
                      *, eps, tnh):
    nh = pl.program_id(1)

    @pl.when(nh == 0)
    def _init():
        x = x_ref[...].astype(jnp.float32)
        inv = jax.lax.rsqrt(jnp.mean(x * x, axis=-1, keepdims=True) + eps)
        xn_ref[...] = ((x * inv) * scale_ref[...].astype(jnp.float32)
                       ).astype(xn_ref.dtype)           # norm computed once per M tile
        acc_ref[...] = jnp.zeros_like(acc_ref)

    xn = xn_ref[...]
    # single MXU call against the packed [gate | up] weight tile
    h12 = jnp.dot(xn, w12_ref[...], preferred_element_type=jnp.float32)
    h1 = h12[:, :tnh]
    h2 = h12[:, tnh:]
    h = (h1 * jax.nn.sigmoid(h1)) * h2                  # SiLU(fc1) * fc2
    acc_ref[...] += jnp.dot(h.astype(w3_ref.dtype), w3_ref[...],
                            preferred_element_type=jnp.float32)

    @pl.when(nh == pl.num_programs(1) - 1)
    def _fin():
        o_ref[...] = (x_ref[...].astype(jnp.float32)
                      + acc_ref[...]).astype(o_ref.dtype)   # fused residual


def _mlp_hidden_tile(Nh):
    return _divisor_tiles(Nh)[0]


def _choose_mlp_m_tile(M, C, tnh, dsz, budget):
    for tm in _divisor_tiles(M):
        need = (2 * tm * C * dsz        # x
                + 2 * tm * C * dsz      # out
                + tm * C * 4            # f32 accumulator
                + tm * C * dsz          # cached xn scratch
                + 4 * C * tnh * dsz     # packed gate/up weight tiles
                + 2 * tnh * C * dsz     # down-proj weight tiles
                + C * dsz)              # scale row
        if need <= budget:
            return tm
    return _divisor_tiles(M)[-1]


def fused_mlp(x2d, scale, w_gate_up, w3, tnh, eps=1e-5):
    """out = x2d + c_proj(silu(fc1(rms(x2d))) * fc2(rms(x2d))).
    w_gate_up is the load-time packed (C, 2*Nh) weight (see pack_gate_up)."""
    M, C = x2d.shape
    Nh, _ = w3.shape
    budget = _vmem_budget_bytes()
    dsz = x2d.dtype.itemsize
    tm = _choose_mlp_m_tile(M, C, tnh, dsz, budget)
    return pl.pallas_call(
        functools.partial(_fused_mlp_kernel, eps=eps, tnh=tnh),
        out_shape=jax.ShapeDtypeStruct((M, C), x2d.dtype),
        grid=(M // tm, Nh // tnh),
        in_specs=[
            pl.BlockSpec((tm, C), lambda m, nh: (m, 0)),
            pl.BlockSpec((1, C), lambda m, nh: (0, 0)),
            pl.BlockSpec((C, 2 * tnh), lambda m, nh: (0, nh)),
            pl.BlockSpec((tnh, C), lambda m, nh: (nh, 0)),
        ],
        out_specs=pl.BlockSpec((tm, C), lambda m, nh: (m, 0)),
        scratch_shapes=[pltpu.VMEM((tm, C), jnp.float32),
                        pltpu.VMEM((tm, C), w_gate_up.dtype)],
        compiler_params=pltpu.CompilerParams(
            dimension_semantics=("parallel", "arbitrary"),
            vmem_limit_bytes=budget),
    )(x2d, scale.reshape(1, C), w_gate_up, w3)


# ------------------------------- JAX glue ------------------------------------

def build_rope_cache(seq_len, n_elem, base=10000.0):
    theta = 1.0 / (base ** (jnp.arange(0, n_elem, 2, dtype=jnp.float32) / n_elem))
    idx_theta = jnp.outer(jnp.arange(seq_len, dtype=jnp.float32), theta)
    return jnp.stack([jnp.cos(idx_theta), jnp.sin(idx_theta)], axis=-1)  # (T, n/2, 2)


def _deinterleave_perm(C, H, hd):
    """Column permutation putting even RoPE features first, odd second, per head
    of the q and k parts of the fused qkv weight (v untouched)."""
    perm = np.concatenate([np.arange(0, hd, 2), np.arange(1, hd, 2)])
    col_perm = np.arange(3 * C)
    for h in range(H):
        col_perm[h * hd:(h + 1) * hd] = h * hd + perm             # q heads
        col_perm[C + h * hd:C + (h + 1) * hd] = C + h * hd + perm  # k heads
    return col_perm


def pack_gate_up(w1, w2, tnh):
    """Interleave w1/w2 column tiles so hidden tile nh is the contiguous slab
    [w1[:, nh*tnh:(nh+1)*tnh] | w2[:, ...]] -> one DMA stream + one MXU call."""
    C, Nh = w1.shape
    a = w1.reshape(C, Nh // tnh, tnh)
    b = w2.reshape(C, Nh // tnh, tnh)
    return jnp.concatenate([a, b], axis=2).reshape(C, 2 * Nh)


def prepare_block_params(params):
    """One-time (load-time) weight prep — done once, not per forward call:
    de-interleave q/k columns of the fused QKV weight (interleaved RoPE ==
    rotate-half RoPE in-kernel) and pack the gate/up MLP weights."""
    p = dict(params)
    C = params["w_attn"].shape[0]
    H = params["n_head"]
    hd = C // H
    p["w_attn"] = jnp.asarray(params["w_attn"])[:, _deinterleave_perm(C, H, hd)]
    Nh = params["w_fc1"].shape[1]
    tnh = _mlp_hidden_tile(Nh)
    p["mlp_tnh"] = tnh
    p["w_gate_up"] = pack_gate_up(params["w_fc1"], params["w_fc2"], tnh)
    return p


def block_forward(x, prepared, rope_cache):
    """LLaMA Block forward (kv_cache=None path). Returns (out, new_kv_cache)."""
    B, T, C = x.shape
    H = prepared["n_head"]
    hd = C // H
    x2 = x.reshape(B * T, C)

    cos = rope_cache[:T, :, 0]
    sin = rope_cache[:T, :, 1]
    cos_f = jnp.concatenate([cos, cos], axis=-1)     # (T, hd)
    sin_f = jnp.concatenate([-sin, sin], axis=-1)    # rotate-half sign folded in

    # --- attention branch: x = x + c_proj(attn(rope(qkv(rms_1(x))))) ---
    qkv = rms_matmul(x2, prepared["rms1_scale"], prepared["w_attn"])   # (B*T, 3C)
    # TODO(synk): emit QKV head-major ((B, 3H, T, hd)) from rms_matmul's
    # out_spec so each attention q/k/v block is one contiguous DMA.
    y = flash_attention(qkv.reshape(B, T, 3 * C), cos_f, sin_f,
                        n_head=H, scale=1.0 / math.sqrt(hd))           # (B, T, C)
    x2 = matmul_residual(y.reshape(B * T, C), prepared["w_proj"], x2)

    # --- MLP branch: x = x + mlp(rms_2(x)) (residual fused in-kernel) ---
    out = fused_mlp(x2, prepared["rms2_scale"], prepared["w_gate_up"],
                    prepared["w_mlp_proj"], prepared["mlp_tnh"])

    # TODO(synk): kv_cache index_copy / torch.roll eviction path not exercised
    # (kv_cache=None), so new_kv_cache is None, matching the module.
    return out.reshape(B, T, C), None


# --------------------------- pure-JAX reference -------------------------------

def apply_rope_ref(x, rope_cache):
    B, T, H, D = x.shape
    xs = x.astype(jnp.float32).reshape(B, T, H, D // 2, 2)
    rc = rope_cache[:T].reshape(1, T, 1, D // 2, 2)
    x0, x1 = xs[..., 0], xs[..., 1]
    c, s = rc[..., 0], rc[..., 1]
    out = jnp.stack([x0 * c - x1 * s, x1 * c + x0 * s], axis=-1)
    return out.reshape(B, T, H, D).astype(x.dtype)


def block_forward_ref(x, params, rope_cache):
    def rms(x2, scale, eps=1e-5):
        n = jnp.mean(x2 * x2, axis=-1, keepdims=True)
        return scale * (x2 * jax.lax.rsqrt(n + eps))

    B, T, C = x.shape
    H = params["n_head"]
    hd = C // H
    x2 = x.reshape(B * T, C)
    xn = rms(x2, params["rms1_scale"])
    qkv = xn @ params["w_attn"]
    q, k, v = jnp.split(qkv, 3, axis=-1)
    q = apply_rope_ref(q.reshape(B, T, H, hd), rope_cache)
    k = apply_rope_ref(k.reshape(B, T, H, hd), rope_cache)
    v = v.reshape(B, T, H, hd)
    q, k, v = (jnp.transpose(t, (0, 2, 1, 3)) for t in (q, k, v))
    s = jnp.einsum("bhqd,bhkd->bhqk", q, k) / math.sqrt(hd)
    mask = jnp.tril(jnp.ones((T, T), bool))
    s = jnp.where(mask[None, None], s, -jnp.inf)
    p = jax.nn.softmax(s, axis=-1)
    y = jnp.einsum("bhqk,bhkd->bhqd", p, v)
    y = jnp.transpose(y, (0, 2, 1, 3)).reshape(B * T, C)
    x2 = x2 + y @ params["w_proj"]
    xn2 = rms(x2, params["rms2_scale"])
    h1 = xn2 @ params["w_fc1"]
    h2 = xn2 @ params["w_fc2"]
    x2 = x2 + (jax.nn.silu(h1) * h2) @ params["w_mlp_proj"]
    return x2.reshape(B, T, C)


# ----------------------------------- main -------------------------------------

if __name__ == "__main__":
    # Small config consistent with the module, but lane-friendly:
    # n_embd=256, n_head=2 (head_dim=128), B=2, T=128.
    B, T, C, H = 2, 128, 256, 2
    hd = C // H
    hidden_dim = 4 * C
    n_hidden = int(2 * hidden_dim / 3)
    if n_hidden % 256 != 0:                    # find_multiple(n_hidden, 256)
        n_hidden = n_hidden + 256 - n_hidden % 256

    key = jax.random.PRNGKey(0)
    ks = jax.random.split(key, 8)

    def init_w(k, fan_in, fan_out):
        return (jax.random.normal(k, (fan_in, fan_out), jnp.float32)
                / math.sqrt(fan_in))

    params = {
        "n_head": H,
        "rms1_scale": 1.0 + 0.1 * jax.random.normal(ks[0], (C,), jnp.float32),
        "rms2_scale": 1.0 + 0.1 * jax.random.normal(ks[1], (C,), jnp.float32),
        "w_attn":     init_w(ks[2], C, 3 * C),       # c_attn.weight^T
        "w_proj":     init_w(ks[3], C, C),           # attn c_proj.weight^T
        "w_fc1":      init_w(ks[4], C, n_hidden),    # mlp c_fc1.weight^T
        "w_fc2":      init_w(ks[5], C, n_hidden),    # mlp c_fc2.weight^T
        "w_mlp_proj": init_w(ks[6], n_hidden, C),    # mlp c_proj.weight^T
    }
    prepared = prepare_block_params(params)          # load-time weight prep

    x = jax.random.normal(ks[7], (B, T, C), jnp.float32)
    rope = build_rope_cache(T, hd)                   # (T, hd//2, 2)

    out, new_kv_cache = block_forward(x, prepared, rope)
    out = jax.block_until_ready(out)

    ref = block_forward_ref(x, params, rope)
    np.testing.assert_allclose(np.asarray(out), np.asarray(ref),
                               rtol=2e-2, atol=2e-2)
    assert out.shape == (B, T, C) and new_kv_cache is None
    assert bool(jnp.all(jnp.isfinite(out)))

    print("KERNEL_OK")
</pallas_src>

<mosaic_0001>
module attributes {stable_mosaic.version = 11 : i64} {
  func.func @_rms_matmul_kernel(%arg0: i32, %arg1: i32, %arg2: i32, %arg3: memref<256x256xf32, #tpu.memory_space<vmem>>, %arg4: memref<1x256xf32, #tpu.memory_space<vmem>>, %arg5: memref<256x256xf32, #tpu.memory_space<vmem>>, %arg6: memref<256x256xf32, #tpu.memory_space<vmem>>, %arg7: memref<256x256xf32, #tpu.memory_space<vmem>>, %arg8: memref<256x1xf32, #tpu.memory_space<vmem>>) attributes {dimension_semantics = [#tpu.dimension_semantics<parallel>, #tpu.dimension_semantics<parallel>, #tpu.dimension_semantics<arbitrary>], iteration_bounds = array<i64: 1, 3, 1>, scalar_prefetch = 0 : i64, scratch_operands = 2 : i64, tpu.core_type = #tpu.core_type<tc>, window_params = [{transform_indices = @transform_0, window_bounds = array<i64: 256, 256>}, {pipeline_mode = #tpu.pipeline_mode<synchronous>, transform_indices = @transform_1, window_bounds = array<i64: 1, 256>}, {transform_indices = @transform_2, window_bounds = array<i64: 256, 256>}, {transform_indices = @transform_3, window_bounds = array<i64: 256, 256>}]} {
    %c0_i32 = arith.constant 0 : i32
    %0 = arith.cmpi eq, %arg2, %c0_i32 : i32
    %1 = arith.extui %0 : i1 to i32
    %c0_i32_0 = arith.constant 0 : i32
    %2 = arith.cmpi ne, %1, %c0_i32_0 : i32
    scf.if %2 {
      %c0_12 = arith.constant 0 : index
      %c0_13 = arith.constant 0 : index
      %22 = vector.load %arg3[%c0_12, %c0_13] : memref<256x256xf32, #tpu.memory_space<vmem>>, vector<256x256xf32>
      %23 = arith.mulf %22, %22 : vector<256x256xf32>
      %cst_14 = arith.constant dense<0.000000e+00> : vector<256xf32>
      %24 = vector.multi_reduction <add>, %23, %cst_14 [1] : vector<256x256xf32> to vector<256xf32>
      %25 = vector.shape_cast %24 : vector<256xf32> to vector<256x1xf32>
      %cst_15 = arith.constant 2.560000e+02 : f32
      %26 = vector.broadcast %cst_15 : f32 to vector<256x1xf32>
      %27 = arith.divf %25, %26 : vector<256x1xf32>
      %cst_16 = arith.constant 9.99999974E-6 : f32
      %28 = vector.broadcast %cst_16 : f32 to vector<256x1xf32>
      %29 = arith.addf %27, %28 : vector<256x1xf32>
      %30 = math.rsqrt %29 : vector<256x1xf32>
      %c0_17 = arith.constant 0 : index
      %c0_18 = arith.constant 0 : index
      %31 = vector.load %arg8[%c0_17, %c0_18] : memref<256x1xf32, #tpu.memory_space<vmem>>, vector<256x1xf32>
      tpu.vector_store %arg8[%c0_17, %c0_18], %30 {strides = array<i32>} : memref<256x1xf32, #tpu.memory_space<vmem>>, vector<256x1xf32>,
      %cst_19 = arith.constant 0.000000e+00 : f32
      %32 = vector.broadcast %cst_19 : f32 to vector<256x256xf32>
      %c0_20 = arith.constant 0 : index
      %c0_21 = arith.constant 0 : index
      %33 = vector.load %arg7[%c0_20, %c0_21] : memref<256x256xf32, #tpu.memory_space<vmem>>, vector<256x256xf32>
      tpu.vector_store %arg7[%c0_20, %c0_21], %32 {strides = array<i32>} : memref<256x256xf32, #tpu.memory_space<vmem>>, vector<256x256xf32>,
    } else {
    }
    %c256_i32 = arith.constant 256 : i32
    %3 = arith.muli %arg2, %c256_i32 : i32
    %4 = tpu.assume_multiple %3, 256 : i32
    %c0 = arith.constant 0 : index
    %5 = arith.index_cast %4 : i32 to index
    %6 = vector.load %arg3[%c0, %5] : memref<256x256xf32, #tpu.memory_space<vmem>>, vector<256x256xf32>
    %c0_1 = arith.constant 0 : index
    %7 = arith.index_cast %4 : i32 to index
    %8 = vector.load %arg4[%c0_1, %7] : memref<1x256xf32, #tpu.memory_space<vmem>>, vector<1x256xf32>
    %c0_2 = arith.constant 0 : index
    %c0_3 = arith.constant 0 : index
    %9 = vector.load %arg8[%c0_2, %c0_3] : memref<256x1xf32, #tpu.memory_space<vmem>>, vector<256x1xf32>
    %10 = vector.broadcast %9 : vector<256x1xf32> to vector<256x256xf32>
    %11 = arith.mulf %6, %10 : vector<256x256xf32>
    %12 = vector.broadcast %8 : vector<1x256xf32> to vector<256x256xf32>
    %13 = arith.mulf %11, %12 : vector<256x256xf32>
    %c0_4 = arith.constant 0 : index
    %c0_5 = arith.constant 0 : index
    %14 = vector.load %arg7[%c0_4, %c0_5] : memref<256x256xf32, #tpu.memory_space<vmem>>, vector<256x256xf32>
    %c0_6 = arith.constant 0 : index
    %c0_7 = arith.constant 0 : index
    %15 = vector.load %arg5[%c0_6, %c0_7] : memref<256x256xf32, #tpu.memory_space<vmem>>, vector<256x256xf32>
    %cst = arith.constant dense<0.000000e+00> : vector<256x256xf32>
    %16 = tpu.matmul %13, %15, %cst {dimension_numbers = #tpu.dot_dimension_numbers<[1], [0], [0], [1], [0, 0, 1, 1], [], []>} : vector<256x256xf32>, vector<256x256xf32>, vector<256x256xf32> -> vector<256x256xf32>
    %17 = arith.addf %14, %16 : vector<256x256xf32>
    %c0_8 = arith.constant 0 : index
    %c0_9 = arith.constant 0 : index
    %18 = vector.load %arg7[%c0_8, %c0_9] : memref<256x256xf32, #tpu.memory_space<vmem>>, vector<256x256xf32>
    tpu.vector_store %arg7[%c0_8, %c0_9], %17 {strides = array<i32>} : memref<256x256xf32, #tpu.memory_space<vmem>>, vector<256x256xf32>,
    %c0_i32_10 = arith.constant 0 : i32
    %19 = arith.cmpi eq, %arg2, %c0_i32_10 : i32
    %20 = arith.extui %19 : i1 to i32
    %c0_i32_11 = arith.constant 0 : i32
    %21 = arith.cmpi ne, %20, %c0_i32_11 : i32
    scf.if %21 {
      %c0_12 = arith.constant 0 : index
      %c0_13 = arith.constant 0 : index
      %22 = vector.load %arg7[%c0_12, %c0_13] : memref<256x256xf32, #tpu.memory_space<vmem>>, vector<256x256xf32>
      %c0_14 = arith.constant 0 : index
      %c0_15 = arith.constant 0 : index
      %23 = vector.load %arg6[%c0_14, %c0_15] : memref<256x256xf32, #tpu.memory_space<vmem>>, vector<256x256xf32>
      tpu.vector_store %arg6[%c0_14, %c0_15], %22 {strides = array<i32>} : memref<256x256xf32, #tpu.memory_space<vmem>>, vector<256x256xf32>,
    } else {
    }
    return
  }
  func.func @transform_0(%arg0: i32, %arg1: i32, %arg2: i32) -> (i32, i32) {
    %c0_i32 = arith.constant 0 : i32
    %c0_i32_0 = arith.constant 0 : i32
    return %arg0, %c0_i32 : i32, i32
  }
  func.func @transform_1(%arg0: i32, %arg1: i32, %arg2: i32) -> (i32, i32) {
    %c0_i32 = arith.constant 0 : i32
    %c0_i32_0 = arith.constant 0 : i32
    %c0_i32_1 = arith.constant 0 : i32
    return %c0_i32, %c0_i32_0 : i32, i32
  }
  func.func @transform_2(%arg0: i32, %arg1: i32, %arg2: i32) -> (i32, i32) {
    %c0_i32 = arith.constant 0 : i32
    return %arg2, %arg1 : i32, i32
  }
  func.func @transform_3(%arg0: i32, %arg1: i32, %arg2: i32) -> (i32, i32) {
    %c0_i32 = arith.constant 0 : i32
    return %arg0, %arg1 : i32, i32
  }
}

</mosaic_0001>

<bundles_post_ra>
// kernel: tpu_custom_call.1
= control target key start
LH: loop header
LB: loop body
LE: loop exit
PB: predicated region body
PF: predicated region fallthrough
CT: control target
= control target key end

     0   :  { %s2745_s0 = inlined_call_operand.hbm [shape: f32[256,256], index: 0, kind: input, shape index: {}]   ;;  %s2746_s1 = inlined_call_operand.hbm [shape: f32[1,256], index: 1, kind: input, shape index: {}]   ;;  %s2747_s2 = inlined_call_operand.hbm [shape: f32[256,768], index: 2, kind: input, shape index: {}]   ;;  %s2748_s3 = inlined_call_operand.hbm [shape: f32[256,768], index: 3, kind: output, shape index: {}]  }
   0x1   :  { %2753 = sst [smem:[#allocation15_spill]] %s2745_s0 }
   0x2   :  { %8 = vsyncpa [#allocation5], 0 }
   0x3   :  { %9 = vsyncpa [#allocation8], 0 }
   0x4   :  { %10 = vsyncpa [#allocation6], 0 }
   0x5   :  { %12 = vsyncpa [#allocation6 + $0x1], 0  ;;  %s2295_s12 = smov 0   ;;  %s2297_s13 = smov 0  }
   0x6   :  { %s2299_s14 = smov 0   ;;  %s2301_s15 = smov 0  }
   0x7   :  { %s2303_s16 = smov 0   ;;  %s2305_s17 = smov 0  }
   0x8 LB: > { %s2326_s18 = sadd.s32 4294967295, %s2262_s17   ;;  %s1854_s19 = sadd.s32 4294967294, %s2262_s17   ;;  %s2262_s17 = sphi %s2305_s17, %s18_s17   ;;  %s2258_s16 = sphi %s2303_s16, %s2774_s16   ;;  %s2254_s15 = sphi %s2301_s15, %s2773_s15   ;;  %s2250_s14 = sphi %s2299_s14, %s2772_s14   ;;  %s2246_s13 = sphi %s2297_s13, %s2771_s13   ;;  %s2242_s12 = sphi %s2295_s12, %s2770_s12  }
   0x9   : > { %s93_s20 = sadd.s32 1, %s2250_s14  ;;  %p100_p0 = scmp.ne.s32.totalorder %s2250_s14, %s2246_s13 }
   0xa   : > { %p101_p1 = scmp.eq.s32.totalorder %s2262_s17, 0  ;;  %p106_p2 = scmp.ne.s32.totalorder %s2246_s13, %s2242_s12 }
   0xb   : > { %p2749_p3 = scmp.eq.s32.totalorder %s2326_s18, 0  ;;  %p132_p4 = scmp.eq.s32.totalorder %s2326_s18, 2 }
   0xc   : > { %p2337_p5 = por %p101_p1, %p100_p0  ;;  %p138_p6 = scmp.eq.s32.totalorder %s1854_s19, 2 }
   0xd   : > { %p2343_p7 = por %p2749_p3, %p106_p2  ;;  %p2347_p8 = por %p132_p4, %p100_p0 }
   0xe   : > { %p2351_p9 = por %p138_p6, %p106_p2  ;;  %p1855_p10 = scmp.ge.s32.totalorder %s2262_s17, 1 }
   0xf   : > { %s2756_s23 = scalar_select %p2347_p8, 1, 0 }
  0x10   : > { %s2757_s24 = scalar_select %p2351_p9, 1, 0 }
  0x11   : > { %p145_p11 = scmp.lt.s32.totalorder %s2262_s17, 4  ;;  %s2264_s26 = smov [#allocation4]  }
  0x12   : > { %s161_s27 = sshll.u32 %s2264_s26, 4  ;;  %p1967_p0 = scmp.lt.s32.totalorder %s2262_s17, 3  ;;  %s162_s27 = int_to_ptr.vmem [resolvable:$true] %s161_s27 }
  0x13   : > { %p2357_p12 = pnand %p1855_p10, %p145_p11  ;;  %s2265_s29 = smov [#allocation7]  }
  0x14   : > { %s175_s30 = sshll.u32 %s2265_s29, 4  ;;  %p2372_p2 = pnand %p1967_p0, %p2337_p5  ;;  %s176_s30 = int_to_ptr.vmem [resolvable:$true] %s175_s30 }
  0x15   : > { %p1950_p13 = pneg %p2357_p12  ;;  %s2105_s5 = scalar_lea.vmem %s162_s27, 8192 }
  0x16   : > { %p2106_p6 = scmp.ne.s32.totalorder %s162_s27, %s2105_s5 }
  0x17   : > { %p2366_p1 = pnand %p1950_p13, %p2749_p3  ;;  %p2113_p13 = scmp.lt.s32.totalorder %s162_s27, %s162_s27 }
  0x18   : > { %p2114_p3 = scmp.lt.s32.totalorder %s2105_s5, %s2105_s5 }
  0x19   : > { %p2096_p4 = pneg %p2366_p1 }
  0x1a   : > { %p2115_p9 = por %p2114_p3, %p2113_p13 }
  0x1b   : > { %p2108_p10 = pnand %p2106_p6, %p2096_p4 }
  0x1d   : > { %p2109_p11 = pneg %p2108_p10 }
  0x1f   : > { %p2116_p8 = pnand %p2115_p9, %p2109_p11 }
  0x21   : > { %2119 = shalt.err (!%p2116_p8)
}
  0x22   : > { %s2751_s6 = smov 256   ;;  %s2752_s7 = smov 16  }
  0x23   : > { %s2761_s0 = sld [smem:[#allocation15_spill]]  ;;  %s2131_s10 = scalar_lea.vmem %s176_s30, 32 }
  0x24   : > { %p2132_p5 = scmp.ne.s32.totalorder %s176_s30, %s2131_s10  ;;  %p2139_p9 = scmp.lt.s32.totalorder %s176_s30, %s176_s30 }
  0x25   : > { %p2140_p8 = scmp.lt.s32.totalorder %s2131_s10, %s2131_s10 }
  0x26   : > { %p2134_p0 = pnand %p2132_p5, %p2096_p4 }
  0x27   : > { %p2141_p6 = por %p2140_p8, %p2139_p9 }
  0x28   : > { %p2135_p3 = pneg %p2134_p0 }
  0x29   : > { %1953 = dma.hbm_to_vmem [thread:$0]  (!%p2366_p1), %s2761_s0, 8192, %s162_s27, [#allocation5], %s2751_s6, %s2751_s6, %s2752_s7  }
  0x2a   : > { %p2142_p10 = pnand %p2141_p6, %p2135_p3 }
  0x2c   : > { %2145 = shalt.err (!%p2142_p10)
}
  0x2d   : > { %1956 = dma.hbm_to_vmem [thread:$0]  (!%p2366_p1), %s2746_s1, 32, %s176_s30, [#allocation8]  }
  0x2e   : > { %s33_s21 = sadd.s32 1, %s2258_s16  ;;  %s186_s26 = sand.u32 1, %s2262_s17  }
  0x2f   : > { %p35_p4 = scmp.ge.s32.totalorder %s33_s21, 3  ;;  %s188_s27 = sand.u32 1, %s2250_s14  }
  0x30   : > { %s1872_s29 = sshll.u32 %s2258_s16, 8  ;;  %s1859_s28 = sshll.u32 %s188_s27, 9 }
  0x31   : > { %s2776_s21 = smov (%p35_p4, %s33_s21), 0  ;;  %s199_s9 = scalar_lea.hbm %s2747_s2, %s1872_s29 }
  0x32   : > { %s89_s10 = ssub.s32 %s2258_s16, %s2776_s21  ;;  %s190_s11 = scalar_lea.vmem [#allocation9], %s1859_s28 }
  0x33   : > { %p91_p11 = scmp.eq.s32.totalorder %s89_s10, 0  ;;  %s200_s19 = sshll.u32 %s190_s11, 4  ;;  %s201_s19 = int_to_ptr.vmem [resolvable:$true] %s200_s19 }
  0x34   : > { %s187_s6 = scalar_lea.sflag [#allocation5], %s186_s26  ;;  %p2148_p1 = pneg %p2372_p2 }
  0x35   : > { %s2411_s30 = scalar_select %p91_p11, %s2250_s14, %s93_s20  }
  0x36   : > { %s2159_s7 = scalar_lea.vmem %s201_s19, 8192  ;;  %s2268_s27 = smov [#allocation9]  }
  0x37   : > { %p2160_p13 = scmp.ne.s32.totalorder %s201_s19, %s2159_s7  ;;  %s2164_s0 = sshll.u32 %s2268_s27, 4  ;;  %s2165_s0 = int_to_ptr.vmem [resolvable:$false] %s2164_s0 }
  0x38   : > { %s2166_s5 = scalar_lea.vmem %s2165_s0, 16384  ;;  %p2167_p3 = scmp.lt.s32.totalorder %s201_s19, %s2165_s0 }
  0x39   : > { %p2162_p5 = pnand %p2160_p13, %p2148_p1  ;;  %p2168_p9 = scmp.lt.s32.totalorder %s2166_s5, %s2159_s7 }
  0x3b   : > { %p2163_p0 = pneg %p2162_p5  ;;  %p2169_p8 = por %p2168_p9, %p2167_p3 }
  0x3d   : > { %p2170_p6 = pnand %p2169_p8, %p2163_p0 }
  0x3f   : > { %2173 = shalt.err (!%p2170_p6)
}
  0x40   : > { %s2269_s29 = smov 768   ;;  %s2762_s20 = smov 16  }
  0x41   : > { %s2763_s26 = smov 256   ;;  %212 = sbr.rel (%p2357_p12) target bundleno = 664 (0x298), region = 32 }
  0x42   : > { %1960 = dma.hbm_to_vmem [thread:$0]  (!%p2372_p2), %s199_s9, 8192, %s201_s19, %s187_s6, %s2269_s29, %s2763_s26, %s2762_s20  }
  0x43   : > { %p2764_p10 = scmp.eq.s32.totalorder (!%p2357_p12), %s2326_s18, 0 }
  0x46   : > { %2225 = dma.done.wait (%p2764_p10), [#allocation5], 8192   ;;  %p2765_p4 = pmov %p2764_p10 }
  0x48   : > { %2227 = vsyncadd (%p2765_p4), [#allocation5], 4294959104  ;;  %p2766_p11 = pmov %p2765_p4 }
  0x49   : > { %p2767_p1 = pmov %p2765_p4 }
  0x4a   : > { %2229 = dma.done.wait (%p2766_p11), [#allocation8], 32  }
  0x4b   : > { %2231 = vsyncadd (%p2767_p1), [#allocation8], 4294967264  ;;  %s222_s0 = sand.u32 1, %s2326_s18   ;;  %s224_s4 = sand.u32 1, %s2246_s13  }
  0x4c   : > { %s2433_s25 = sshll.u32 %s224_s4, 9  ;;  %s223_s6 = scalar_lea.sflag [#allocation5], %s222_s0 }
  0x4d   : > { %s2436_s7 = scalar_lea.vmem [#allocation9], %s2433_s25 }
  0x4e   : > { %2233 = dma.done.wait (%p2343_p7), %s223_s6, 8192  }
  0x4f   : > { %2235 = vsyncadd (%p2343_p7), %s223_s6, 4294959104  ;;  %v260_v0 = vld [vmem:[#allocation4 + $0x10] sm:$0xff]  ;;  %v261_v1 = vld [vmem:[#allocation4 + $0x18] sm:$0xff]  ;;  %vm579_vm0 = vcmask 7168   ;;  %s2623_s18 = scalar_lea.vmem [#allocation10], %s2433_s25  ;;  %s1873_s22 = sshll.u32 %s2254_s15, 8 }
  0x50   : > { %v258_v2 = vld [vmem:[#allocation4] sm:$0xff]  ;;  %v324_v3 = vmul.f32 %v260_v0, %v260_v0  ;;  %v325_v4 = vmul.f32 %v261_v1, %v261_v1  ;;  %v259_v5 = vld [vmem:[#allocation4 + $0x8] sm:$0xff]  ;;  %v292_v7 = vld [vmem:[#allocation4 + $0x110] sm:$0xff]  ;;  %s1739_s28 = sshll.u32 %s2623_s18, 4  ;;  %s2690_s10 = scalar_lea.hbm %s2748_s3, %s1873_s22  ;;  %s2692_s28 = int_to_ptr.vmem [resolvable:$true] %s1739_s28 }
  0x51   : > { %v322_v6 = vmul.f32 %v258_v2, %v258_v2  ;;  %v293_v8 = vld [vmem:[#allocation4 + $0x118] sm:$0xff]  ;;  %v323_v9 = vmul.f32 %v259_v5, %v259_v5  ;;  %v356_v10 = vmul.f32 %v292_v7, %v292_v7  ;;  %v290_v12 = vld [vmem:[#allocation4 + $0x100] sm:$0xff]  ;;  %v291_v13 = vld [vmem:[#allocation4 + $0x108] sm:$0xff]  ;;  %s2700_s15 = scalar_lea.sflag [#allocation6], %s224_s4  ;;  %s2174_s11 = scalar_lea.vmem %s2692_s28, 8192 }
  0x52   : > { %v357_v11 = vmul.f32 %v293_v8, %v293_v8  ;;  %v294_v14 = vld [vmem:[#allocation4 + $0x120] sm:$0xff]  ;;  %v389_v15 = vadd.f32 %v325_v4, %v324_v3  ;;  %v354_v16 = vmul.f32 %v290_v12, %v290_v12  ;;  %v355_v17 = vmul.f32 %v291_v13, %v291_v13  ;;  %v295_v18 = vld [vmem:[#allocation4 + $0x128] sm:$0xff]  ;;  %v296_v26 = vld [vmem:[#allocation4 + $0x130] sm:$0xff]  ;;  %p2175_p7 = scmp.ne.s32.totalorder %s2692_s28, %s2174_s11  ;;  %p2768_p12 = scmp.ne.s32.totalorder %s2756_s23, 0 }
  0x53   : > { %v386_v19 = vadd.f32 %v323_v9, %v322_v6  ;;  %v262_v20 = vld [vmem:[#allocation4 + $0x20] sm:$0xff]  ;;  %v358_v22 = vmul.f32 %v294_v14, %v294_v14  ;;  %v359_v23 = vmul.f32 %v295_v18, %v295_v18  ;;  %v263_v24 = vld [vmem:[#allocation4 + $0x28] sm:$0xff]  ;;  %v297_v27 = vld [vmem:[#allocation4 + $0x138] sm:$0xff]  ;;  %v360_v33 = vmul.f32 %v296_v26, %v296_v26  ;;  %s2271_s19 = smov [#allocation10]  }
  0x54   : > { %390 = vadd.xlane.f32.xlu1 %v389_v15  ;;  %v437_v21 = vadd.f32 %v357_v11, %v356_v10  ;;  %v434_v25 = vadd.f32 %v355_v17, %v354_v16  ;;  %v326_v28 = vmul.f32 %v262_v20, %v262_v20  ;;  %v327_v29 = vmul.f32 %v263_v24, %v263_v24  ;;  %v264_v30 = vld [vmem:[#allocation4 + $0x30] sm:$0xff]  ;;  %v265_v31 = vld [vmem:[#allocation4 + $0x38] sm:$0xff]  ;;  %v298_v35 = vld [vmem:[#allocation4 + $0x140] sm:$0xff]  ;;  %p2176_p2 = pnand %p2175_p7, %p2768_p12  ;;  %s2178_s27 = sshll.u32 %s2271_s19, 4  ;;  %s2179_s27 = int_to_ptr.vmem [resolvable:$false] %s2178_s27 }
  0x55   : > { %387 = vadd.xlane.f32.xlu0 %v386_v19  ;;  %v440_v32 = vadd.f32 %v359_v23, %v358_v22  ;;  %v361_v34 = vmul.f32 %v297_v27, %v297_v27  ;;  %v299_v36 = vld [vmem:[#allocation4 + $0x148] sm:$0xff]  ;;  %v328_v38 = vmul.f32 %v264_v30, %v264_v30  ;;  %v329_v39 = vmul.f32 %v265_v31, %v265_v31  ;;  %v266_v40 = vld [vmem:[#allocation4 + $0x40] sm:$0xff]  ;;  %v300_v45 = vld [vmem:[#allocation4 + $0x150] sm:$0xff]  ;;  %s2180_s5 = scalar_lea.vmem %s2179_s27, 16384  ;;  %p2181_p5 = scmp.lt.s32.totalorder %s2692_s28, %s2179_s27 }
  0x56   : > { %v392_v37 = vadd.f32 %v327_v29, %v326_v28  ;;  %v267_v41 = vld [vmem:[#allocation4 + $0x48] sm:$0xff]  ;;  %v362_v43 = vmul.f32 %v298_v35, %v298_v35  ;;  %v363_v44 = vmul.f32 %v299_v36, %v299_v36  ;;  %v301_v46 = vld [vmem:[#allocation4 + $0x158] sm:$0xff]  ;;  %v330_v48 = vmul.f32 %v266_v40, %v266_v40  ;;  %v268_v50 = vld [vmem:[#allocation4 + $0x50] sm:$0xff]  ;;  %p2177_p13 = pneg %p2176_p2  ;;  %p2182_p0 = scmp.lt.s32.totalorder %s2180_s5, %s2174_s11 }
  0x57   : > { %v443_v42 = vadd.f32 %v361_v34, %v360_v33  ;;  %v395_v47 = vadd.f32 %v329_v39, %v328_v38  ;;  %v331_v49 = vmul.f32 %v267_v41, %v267_v41  ;;  %v269_v51 = vld [vmem:[#allocation4 + $0x58] sm:$0xff]  ;;  %v364_v53 = vmul.f32 %v300_v45, %v300_v45  ;;  %v302_v55 = vld [vmem:[#allocation4 + $0x160] sm:$0xff]  ;;  %v303_v56 = vld [vmem:[#allocation4 + $0x168] sm:$0xff] }
  0x58   : > { %438 = vadd.xlane.f32.xlu1 %v437_v21  ;;  %v446_v52 = vadd.f32 %v363_v44, %v362_v43  ;;  %v365_v54 = vmul.f32 %v301_v46, %v301_v46  ;;  %v332_v58 = vmul.f32 %v268_v50, %v268_v50  ;;  %v333_v59 = vmul.f32 %v269_v51, %v269_v51  ;;  %v270_v60 = vld [vmem:[#allocation4 + $0x60] sm:$0xff]  ;;  %v271_v61 = vld [vmem:[#allocation4 + $0x68] sm:$0xff]  ;;  %v304_v1 = vld [vmem:[#allocation4 + $0x170] sm:$0xff]  ;;  %p2183_p3 = por %p2182_p0, %p2181_p5 }
  0x59   : > { %435 = vadd.xlane.f32.xlu0 %v434_v25  ;;  %v398_v57 = vadd.f32 %v331_v49, %v330_v48  ;;  %v366_v63 = vmul.f32 %v302_v55, %v302_v55  ;;  %v367_v0 = vmul.f32 %v303_v56, %v303_v56  ;;  %v305_v2 = vld [vmem:[#allocation4 + $0x178] sm:$0xff]  ;;  %v334_v4 = vmul.f32 %v270_v60, %v270_v60  ;;  %v272_v6 = vld [vmem:[#allocation4 + $0x70] sm:$0xff]  ;;  %v306_v11 = vld [vmem:[#allocation4 + $0x180] sm:$0xff] }
  0x5a   : > { %v449_v62 = vadd.f32 %v365_v54, %v364_v53  ;;  %v401_v3 = vadd.f32 %v333_v59, %v332_v58  ;;  %v335_v5 = vmul.f32 %v271_v61, %v271_v61  ;;  %v273_v7 = vld [vmem:[#allocation4 + $0x78] sm:$0xff]  ;;  %v368_v9 = vmul.f32 %v304_v1, %v304_v1  ;;  %v307_v12 = vld [vmem:[#allocation4 + $0x188] sm:$0xff]  ;;  %v274_v16 = vld [vmem:[#allocation4 + $0x80] sm:$0xff]  ;;  %p2184_p9 = pnand %p2183_p3, %p2177_p13 }
  0x5b   : > { %v452_v8 = vadd.f32 %v367_v0, %v366_v63  ;;  %v369_v10 = vmul.f32 %v305_v2, %v305_v2  ;;  %v336_v14 = vmul.f32 %v272_v6, %v272_v6  ;;  %v337_v15 = vmul.f32 %v273_v7, %v273_v7  ;;  %v275_v17 = vld [vmem:[#allocation4 + $0x88] sm:$0xff]  ;;  %v308_v21 = vld [vmem:[#allocation4 + $0x190] sm:$0xff]  ;;  %v309_v22 = vld [vmem:[#allocation4 + $0x198] sm:$0xff] }
  0x5c   : > { %441 = vadd.xlane.f32.xlu1 %v440_v32  ;;  %v404_v13 = vadd.f32 %v335_v5, %v334_v4  ;;  %v370_v19 = vmul.f32 %v306_v11, %v306_v11  ;;  %v371_v20 = vmul.f32 %v307_v12, %v307_v12  ;;  %v338_v24 = vmul.f32 %v274_v16, %v274_v16  ;;  %v276_v26 = vld [vmem:[#allocation4 + $0x90] sm:$0xff]  ;;  %v277_v27 = vld [vmem:[#allocation4 + $0x98] sm:$0xff]  ;;  %v310_v31 = vld [vmem:[#allocation4 + $0x1a0] sm:$0xff] }
  0x5d   : > { %393 = vadd.xlane.f32.xlu0 %v392_v37  ;;  %v455_v18 = vadd.f32 %v369_v10, %v368_v9  ;;  %v407_v23 = vadd.f32 %v337_v15, %v336_v14  ;;  %v339_v25 = vmul.f32 %v275_v17, %v275_v17  ;;  %v372_v29 = vmul.f32 %v308_v21, %v308_v21  ;;  %v311_v32 = vld [vmem:[#allocation4 + $0x1a8] sm:$0xff]  ;;  %v278_v36 = vld [vmem:[#allocation4 + $0xa0] sm:$0xff]  ;;  %v312_v41 = vld [vmem:[#allocation4 + $0x1b0] sm:$0xff] }
  0x5e   : > { %v458_v28 = vadd.f32 %v371_v20, %v370_v19  ;;  %v373_v30 = vmul.f32 %v309_v22, %v309_v22  ;;  %v340_v34 = vmul.f32 %v276_v26, %v276_v26  ;;  %v341_v35 = vmul.f32 %v277_v27, %v277_v27  ;;  %v279_v37 = vld [vmem:[#allocation4 + $0xa8] sm:$0xff]  ;;  %v280_v46 = vld [vmem:[#allocation4 + $0xb0] sm:$0xff]  ;;  %v317_v63 = vld [vmem:[#allocation4 + $0x1d8] sm:$0xff] }
  0x5f   : > { %v410_v33 = vadd.f32 %v339_v25, %v338_v24  ;;  %v374_v39 = vmul.f32 %v310_v31, %v310_v31  ;;  %v375_v40 = vmul.f32 %v311_v32, %v311_v32  ;;  %v342_v44 = vmul.f32 %v278_v36, %v278_v36  ;;  %v315_v53 = vld [vmem:[#allocation4 + $0x1c8] sm:$0xff]  ;;  %v285_v4 = vld [vmem:[#allocation4 + $0xd8] sm:$0xff] }
  0x60   : > { %444 = vadd.xlane.f32.xlu1 %v443_v42  ;;  %v461_v38 = vadd.f32 %v373_v30, %v372_v29  ;;  %v313_v42 = vld [vmem:[#allocation4 + $0x1b8] sm:$0xff]  ;;  %v413_v43 = vadd.f32 %v341_v35, %v340_v34  ;;  %v343_v45 = vmul.f32 %v279_v37, %v279_v37  ;;  %v376_v49 = vmul.f32 %v312_v41, %v312_v41  ;;  %v283_v58 = vld [vmem:[#allocation4 + $0xc8] sm:$0xff] }
  0x61   : > { %396 = vadd.xlane.f32.xlu0 %v395_v47  ;;  %v281_v47 = vld [vmem:[#allocation4 + $0xb8] sm:$0xff]  ;;  %v464_v48 = vadd.f32 %v375_v40, %v374_v39  ;;  %v377_v50 = vmul.f32 %v313_v42, %v313_v42  ;;  %v2270_v51 = vmov 0   ;;  %v344_v55 = vmul.f32 %v280_v46, %v280_v46  ;;  %v319_v9 = vld [vmem:[#allocation4 + $0x1e8] sm:$0xff] }
  0x62   : > { %2028 = vset.pattern.permute.xlu0 %v2270_v51  ;;  %v416_v54 = vadd.f32 %v343_v45, %v342_v44  ;;  %v345_v56 = vmul.f32 %v281_v47, %v281_v47  ;;  %2029 = vset.pattern.permute.xlu1 %v2270_v51  ;;  %v379_v61 = vmul.f32 %v315_v53, %v315_v53  ;;  %v287_v14 = vld [vmem:[#allocation4 + $0xe8] sm:$0xff]  ;;  %v321_v19 = vld [vmem:[#allocation4 + $0x1f8] sm:$0xff] }
  0x63   : > { %v467_v59 = vadd.f32 %v377_v50, %v376_v49  ;;  %v347_v2 = vmul.f32 %v283_v58, %v283_v58  ;;  %v381_v7 = vmul.f32 %v317_v63, %v317_v63  ;;  %v349_v12 = vmul.f32 %v285_v4, %v285_v4  ;;  %v289_v24 = vld [vmem:[#allocation4 + $0xf8] sm:$0xff]  ;;  %v1171_v35 = vld [vmem:[%s2436_s7 + $0xe8] sm:$0xff]  ;;  %v1170_v36 = vld [vmem:[%s2436_s7 + $0xe0] sm:$0xff] }
  0x64   : > { %447 = vadd.xlane.f32.xlu1 %v446_v52  ;;  %v314_v52 = vld [vmem:[#allocation4 + $0x1c0] sm:$0xff]  ;;  %v419_v0 = vadd.f32 %v345_v56, %v344_v55  ;;  %v383_v17 = vmul.f32 %v319_v9, %v319_v9  ;;  %v351_v22 = vmul.f32 %v287_v14, %v287_v14  ;;  %v385_v27 = vmul.f32 %v321_v19, %v321_v19  ;;  %v1172_v34 = vld [vmem:[%s2436_s7 + $0xf0] sm:$0xff]  ;;  %v1167_v39 = vld [vmem:[%s2436_s7 + $0xc8] sm:$0xff] }
  0x65   : > { %399 = vadd.xlane.f32.xlu0 %v398_v57  ;;  %v282_v57 = vld [vmem:[#allocation4 + $0xc0] sm:$0xff]  ;;  %v378_v60 = vmul.f32 %v314_v52, %v314_v52  ;;  %v353_v30 = vmul.f32 %v289_v24, %v289_v24  ;;  %v1164_v42 = vld [vmem:[%s2436_s7 + $0xb0] sm:$0xff]  ;;  %v1159_v47 = vld [vmem:[%s2436_s7 + $0x88] sm:$0xff] }
  0x66   : > { %v346_v1 = vmul.f32 %v282_v57, %v282_v57  ;;  %v1169_v37 = vld [vmem:[%s2436_s7 + $0xd8] sm:$0xff]  ;;  %v1166_v40 = vld [vmem:[%s2436_s7 + $0xc0] sm:$0xff]  ;;  %v1160_v46 = vld [vmem:[%s2436_s7 + $0x90] sm:$0xff] }
  0x67   : > { %v470_v5 = vadd.f32 %v379_v61, %v378_v60  ;;  %v1165_v41 = vld [vmem:[%s2436_s7 + $0xb8] sm:$0xff]  ;;  %v1162_v44 = vld [vmem:[%s2436_s7 + $0xa0] sm:$0xff]  ;;  %v1156_v50 = vld [vmem:[%s2436_s7 + $0x70] sm:$0xff] }
  0x68   : > { %450 = vadd.xlane.f32.xlu1 %v449_v62  ;;  %v316_v62 = vld [vmem:[#allocation4 + $0x1d0] sm:$0xff]  ;;  %v422_v10 = vadd.f32 %v347_v2, %v346_v1  ;;  %v1161_v45 = vld [vmem:[%s2436_s7 + $0x98] sm:$0xff]  ;;  %v1154_v52 = vld [vmem:[%s2436_s7 + $0x60] sm:$0xff] }
  0x69   : > { %402 = vadd.xlane.f32.xlu0 %v401_v3  ;;  %v284_v3 = vld [vmem:[#allocation4 + $0xd0] sm:$0xff]  ;;  %v380_v6 = vmul.f32 %v316_v62, %v316_v62  ;;  %v1157_v49 = vld [vmem:[%s2436_s7 + $0x78] sm:$0xff]  ;;  %v1150_v56 = vld [vmem:[%s2436_s7 + $0x40] sm:$0xff] }
  0x6a   : > { %v348_v11 = vmul.f32 %v284_v3, %v284_v3  ;;  %v1155_v51 = vld [vmem:[%s2436_s7 + $0x68] sm:$0xff]  ;;  %v1153_v53 = vld [vmem:[%s2436_s7 + $0x58] sm:$0xff]  ;;  %v1148_v58 = vld [vmem:[%s2436_s7 + $0x30] sm:$0xff] }
  0x6b   : > { %v473_v15 = vadd.f32 %v381_v7, %v380_v6  ;;  %v1151_v55 = vld [vmem:[%s2436_s7 + $0x48] sm:$0xff]  ;;  %v1149_v57 = vld [vmem:[%s2436_s7 + $0x38] sm:$0xff]  ;;  %v1146_v60 = vld [vmem:[%s2436_s7 + $0x20] sm:$0xff] }
  0x6c   : > { %453 = vadd.xlane.f32.xlu1 %v452_v8  ;;  %v318_v8 = vld [vmem:[#allocation4 + $0x1e0] sm:$0xff]  ;;  %v425_v20 = vadd.f32 %v349_v12, %v348_v11  ;;  %v1144_v62 = vld [vmem:[%s2436_s7 + $0x10] sm:$0xff]  ;;  %v1143_v63 = vld [vmem:[%s2436_s7 + $0x8] sm:$0xff] }
  0x6d   : > { %405 = vadd.xlane.f32.xlu0 %v404_v13  ;;  %v286_v13 = vld [vmem:[#allocation4 + $0xe0] sm:$0xff]  ;;  %v382_v16 = vmul.f32 %v318_v8, %v318_v8  ;;  %v1204_v2 = vld [vmem:[%s2436_s7 + $0x1f0] sm:$0xff]  ;;  %v1203_v3 = vld [vmem:[%s2436_s7 + $0x1e8] sm:$0xff] }
  0x6e   : > { %v350_v21 = vmul.f32 %v286_v13, %v286_v13  ;;  %v1145_v61 = vld [vmem:[%s2436_s7 + $0x18] sm:$0xff]  ;;  %v1202_v4 = vld [vmem:[%s2436_s7 + $0x1e0] sm:$0xff]  ;;  %v1200_v6 = vld [vmem:[%s2436_s7 + $0x1d0] sm:$0xff] }
  0x6f   : > { %v476_v25 = vadd.f32 %v383_v17, %v382_v16  ;;  %v1205_v1 = vld [vmem:[%s2436_s7 + $0x1f8] sm:$0xff]  ;;  %v1199_v8 = vld [vmem:[%s2436_s7 + $0x1c8] sm:$0xff]  ;;  %v1198_v11 = vld [vmem:[%s2436_s7 + $0x1c0] sm:$0xff] }
  0x70   : > { %456 = vadd.xlane.f32.xlu1 %v455_v18  ;;  %v320_v18 = vld [vmem:[#allocation4 + $0x1f0] sm:$0xff]  ;;  %v1197_v13 = vld [vmem:[%s2436_s7 + $0x1b8] sm:$0xff] }
  0x71   : > { %408 = vadd.xlane.f32.xlu0 %v407_v23  ;;  %v288_v23 = vld [vmem:[#allocation4 + $0xf0] sm:$0xff]  ;;  %v384_v26 = vmul.f32 %v320_v18, %v320_v18 }
  0x72   : > { %v352_v29 = vmul.f32 %v288_v23, %v288_v23  ;;  %v1195_v18 = vld [vmem:[%s2436_s7 + $0x1a8] sm:$0xff]  ;;  %v1193_v23 = vld [vmem:[%s2436_s7 + $0x198] sm:$0xff] }
  0x73   : > { %v479_v31 = vadd.f32 %v385_v27, %v384_v26 }
  0x74   : > { %459 = vadd.xlane.f32.xlu1 %v458_v28  ;;  %v428_v28 = vadd.f32 %v351_v22, %v350_v21  ;;  %v431_v32 = vadd.f32 %v353_v30, %v352_v29  ;;  %v1194_v21 = vld [vmem:[%s2436_s7 + $0x1a0] sm:$0xff] }
  0x75   : > { %411 = vadd.xlane.f32.xlu0 %v410_v33  ;;  %v1173_v33 = vld [vmem:[%s2436_s7 + $0xf8] sm:$0xff] }
  0x76   : > { %1206 = vmatprep.subr.mxu0 %v1173_v33  ;;  %1874 = vmatprep.subr.mxu1 %v1173_v33  ;;  %v1189_v33 = vld [vmem:[%s2436_s7 + $0x178] sm:$0xff] }
  0x77   : > { %1207 = vmatpush1.msra.mxu0 %v1172_v34  ;;  %1906 = vmatpush1.msra.mxu1 %v1172_v34 }
  0x78   : > { %462 = vadd.xlane.f32.xlu1 %v461_v38  ;;  %1208 = vmatprep.subr.mxu0 %v1171_v35  ;;  %v1168_v38 = vld [vmem:[%s2436_s7 + $0xd0] sm:$0xff] }
  0x79   : > { %414 = vadd.xlane.f32.xlu0 %v413_v43  ;;  %1875 = vmatprep.subr.mxu1 %v1171_v35  ;;  %v1163_v43 = vld [vmem:[%s2436_s7 + $0xa8] sm:$0xff]  ;;  %v1188_v35 = vld [vmem:[%s2436_s7 + $0x170] sm:$0xff] }
  0x7a   : > { %1209 = vmatpush1.msra.mxu0 %v1170_v36  ;;  %1907 = vmatpush1.msra.mxu1 %v1170_v36 }
  0x7b   : > { %1210 = vmatprep.subr.mxu0 %v1169_v37  ;;  %1876 = vmatprep.subr.mxu1 %v1169_v37 }
  0x7c   : > { %465 = vadd.xlane.f32.xlu1 %v464_v48  ;;  %1211 = vmatpush1.msra.mxu0 %v1168_v38  ;;  %v1158_v48 = vld [vmem:[%s2436_s7 + $0x80] sm:$0xff] }
  0x7d   : > { %417 = vadd.xlane.f32.xlu0 %v416_v54  ;;  %1908 = vmatpush1.msra.mxu1 %v1168_v38  ;;  %v1152_v54 = vld [vmem:[%s2436_s7 + $0x50] sm:$0xff]  ;;  %v1187_v38 = vld [vmem:[%s2436_s7 + $0x168] sm:$0xff] }
  0x7e   : > { %1212 = vmatprep.subr.mxu0 %v1167_v39  ;;  %1877 = vmatprep.subr.mxu1 %v1167_v39 }
  0x7f   : > { %1213 = vmatpush1.msra.mxu0 %v1166_v40  ;;  %1909 = vmatpush1.msra.mxu1 %v1166_v40 }
  0x80   : > { %468 = vadd.xlane.f32.xlu1 %v467_v59  ;;  %1214 = vmatprep.subr.mxu0 %v1165_v41  ;;  %v1147_v59 = vld [vmem:[%s2436_s7 + $0x28] sm:$0xff] }
  0x81   : > { %420 = vadd.xlane.f32.xlu0 %v419_v0  ;;  %1878 = vmatprep.subr.mxu1 %v1165_v41  ;;  %v1142_v0 = vld [vmem:[%s2436_s7] sm:$0xff] }
  0x82   : > { %1215 = vmatpush1.msra.mxu0 %v1164_v42  ;;  %1910 = vmatpush1.msra.mxu1 %v1164_v42  ;;  %v1186_v41 = vld [vmem:[%s2436_s7 + $0x160] sm:$0xff] }
  0x83   : > { %1216 = vmatprep.subr.mxu0 %v1163_v43  ;;  %1879 = vmatprep.subr.mxu1 %v1163_v43  ;;  %v1185_v43 = vld [vmem:[%s2436_s7 + $0x158] sm:$0xff] }
  0x84   : > { %471 = vadd.xlane.f32.xlu1 %v470_v5  ;;  %1217 = vmatpush1.msra.mxu0 %v1162_v44  ;;  %v1201_v5 = vld [vmem:[%s2436_s7 + $0x1d8] sm:$0xff] }
  0x85   : > { %423 = vadd.xlane.f32.xlu0 %v422_v10  ;;  %1911 = vmatpush1.msra.mxu1 %v1162_v44 }
  0x86   : > { %1218 = vmatprep.subr.mxu0 %v1161_v45  ;;  %1880 = vmatprep.subr.mxu1 %v1161_v45  ;;  %v1184_v45 = vld [vmem:[%s2436_s7 + $0x150] sm:$0xff] }
  0x87   : > { %1219 = vmatpush1.msra.mxu0 %v1160_v46  ;;  %1912 = vmatpush1.msra.mxu1 %v1160_v46 }
  0x88   : > { %474 = vadd.xlane.f32.xlu1 %v473_v15  ;;  %1220 = vmatprep.subr.mxu0 %v1159_v47  ;;  %v1196_v15 = vld [vmem:[%s2436_s7 + $0x1b0] sm:$0xff] }
  0x89   : > { %426 = vadd.xlane.f32.xlu0 %v425_v20  ;;  %1881 = vmatprep.subr.mxu1 %v1159_v47 }
  0x8a   : > { %1221 = vmatpush1.msra.mxu0 %v1158_v48  ;;  %1913 = vmatpush1.msra.mxu1 %v1158_v48  ;;  %v1183_v48 = vld [vmem:[%s2436_s7 + $0x148] sm:$0xff] }
  0x8b   : > { %1222 = vmatprep.subr.mxu0 %v1157_v49  ;;  %1882 = vmatprep.subr.mxu1 %v1157_v49 }
  0x8c   : > { %477 = vadd.xlane.f32.xlu1 %v476_v25  ;;  %1223 = vmatpush1.msra.mxu0 %v1156_v50  ;;  %v1192_v25 = vld [vmem:[%s2436_s7 + $0x190] sm:$0xff] }
  0x8d   : > { %429 = vadd.xlane.f32.xlu0 %v428_v28  ;;  %1914 = vmatpush1.msra.mxu1 %v1156_v50  ;;  %v1191_v28 = vld [vmem:[%s2436_s7 + $0x188] sm:$0xff] }
  0x8e   : > { %1224 = vmatprep.subr.mxu0 %v1155_v51  ;;  %1883 = vmatprep.subr.mxu1 %v1155_v51  ;;  %v1182_v51 = vld [vmem:[%s2436_s7 + $0x140] sm:$0xff] }
  0x8f   : > { %1225 = vmatpush1.msra.mxu0 %v1154_v52  ;;  %1915 = vmatpush1.msra.mxu1 %v1154_v52 }
  0x90   : > { %480 = vadd.xlane.f32.xlu1 %v479_v31  ;;  %1226 = vmatprep.subr.mxu0 %v1153_v53  ;;  %v1190_v31 = vld [vmem:[%s2436_s7 + $0x180] sm:$0xff] }
  0x91   : > { %432 = vadd.xlane.f32.xlu0 %v431_v32  ;;  %1884 = vmatprep.subr.mxu1 %v1153_v53 }
  0x92   : > { %1227 = vmatpush1.msra.mxu0 %v1152_v54  ;;  %1916 = vmatpush1.msra.mxu1 %v1152_v54  ;;  %v1181_v54 = vld [vmem:[%s2436_s7 + $0x138] sm:$0xff] }
  0x93   : > { %1228 = vmatprep.subr.mxu0 %v1151_v55  ;;  %1885 = vmatprep.subr.mxu1 %v1151_v55 }
  0x94   : > { %1229 = vmatpush1.msra.mxu0 %v1150_v56  ;;  %1917 = vmatpush1.msra.mxu1 %v1150_v56 }
  0x95   : > { %1230 = vmatprep.subr.mxu0 %v1149_v57  ;;  %1886 = vmatprep.subr.mxu1 %v1149_v57  ;;  %v1180_v57 = vld [vmem:[%s2436_s7 + $0x130] sm:$0xff] }
  0x96   : > { %1231 = vmatpush1.msra.mxu0 %v1148_v58  ;;  %1918 = vmatpush1.msra.mxu1 %v1148_v58 }
  0x97   : > { %1232 = vmatprep.subr.mxu0 %v1147_v59  ;;  %1887 = vmatprep.subr.mxu1 %v1147_v59 }
  0x98   : > { %1233 = vmatpush1.msra.mxu0 %v1146_v60  ;;  %1919 = vmatpush1.msra.mxu1 %v1146_v60  ;;  %v1179_v60 = vld [vmem:[%s2436_s7 + $0x128] sm:$0xff] }
  0x99   : > { %1234 = vmatprep.subr.mxu0 %v1145_v61  ;;  %1888 = vmatprep.subr.mxu1 %v1145_v61 }
  0x9a   : > { %1235 = vmatpush1.msra.mxu0 %v1144_v62  ;;  %1920 = vmatpush1.msra.mxu1 %v1144_v62 }
  0x9b   : > { %1236 = vmatprep.subr.mxu0 %v1143_v63  ;;  %1889 = vmatprep.subr.mxu1 %v1143_v63 }
  0x9c   : > { %1237 = vmatpush1.msra.mxu0 %v1142_v0  ;;  %1921 = vmatpush1.msra.mxu1 %v1142_v0 }
  0x9d   : > { %1238 = vmatprep.subr.mxu0 %v1205_v1  ;;  %1890 = vmatprep.subr.mxu1 %v1205_v1 }
  0x9e   : > { %1239 = vmatpush2.msra.mxu0 %v1204_v2  ;;  %1922 = vmatpush2.msra.mxu1 %v1204_v2 }
  0x9f   : > { %1240 = vmatprep.subr.mxu0 %v1203_v3  ;;  %1891 = vmatprep.subr.mxu1 %v1203_v3  ;;  %v1178_v3 = vld [vmem:[%s2436_s7 + $0x120] sm:$0xff] }
  0xa0   : > { %1241 = vmatpush2.msra.mxu0 %v1202_v4  ;;  %1923 = vmatpush2.msra.mxu1 %v1202_v4 }
  0xa1   : > { %1242 = vmatprep.subr.mxu0 %v1201_v5  ;;  %1892 = vmatprep.subr.mxu1 %v1201_v5 }
  0xa2   : > { %1243 = vmatpush2.msra.mxu0 %v1200_v6  ;;  %1924 = vmatpush2.msra.mxu1 %v1200_v6  ;;  %v1177_v6 = vld [vmem:[%s2436_s7 + $0x118] sm:$0xff] }
  0xa3   : > { %1244 = vmatprep.subr.mxu0 %v1199_v8  ;;  %1893 = vmatprep.subr.mxu1 %v1199_v8 }
  0xa4   : > { %1245 = vmatpush2.msra.mxu0 %v1198_v11  ;;  %1925 = vmatpush2.msra.mxu1 %v1198_v11 }
  0xa5   : > { %1246 = vmatprep.subr.mxu0 %v1197_v13  ;;  %1894 = vmatprep.subr.mxu1 %v1197_v13 }
  0xa6   : > { %1247 = vmatpush2.msra.mxu0 %v1196_v15  ;;  %1926 = vmatpush2.msra.mxu1 %v1196_v15 }
  0xa7   : > { %1248 = vmatprep.subr.mxu0 %v1195_v18  ;;  %1895 = vmatprep.subr.mxu1 %v1195_v18 }
  0xa8   : > { %1249 = vmatpush2.msra.mxu0 %v1194_v21  ;;  %1927 = vmatpush2.msra.mxu1 %v1194_v21 }
  0xa9   : > { %1250 = vmatprep.subr.mxu0 %v1193_v23  ;;  %1896 = vmatprep.subr.mxu1 %v1193_v23 }
  0xaa   : > { %1251 = vmatpush2.msra.mxu0 %v1192_v25  ;;  %1928 = vmatpush2.msra.mxu1 %v1192_v25 }
  0xab   : > { %1252 = vmatprep.subr.mxu0 %v1191_v28  ;;  %1897 = vmatprep.subr.mxu1 %v1191_v28 }
  0xac   : > { %1253 = vmatpush2.msra.mxu0 %v1190_v31  ;;  %1929 = vmatpush2.msra.mxu1 %v1190_v31 }
  0xad   : > { %1254 = vmatprep.subr.mxu0 %v1189_v33  ;;  %1898 = vmatprep.subr.mxu1 %v1189_v33 }
  0xae   : > { %1255 = vmatpush2.msra.mxu0 %v1188_v35  ;;  %1930 = vmatpush2.msra.mxu1 %v1188_v35 }
  0xaf   : > { %1256 = vmatprep.subr.mxu0 %v1187_v38  ;;  %1899 = vmatprep.subr.mxu1 %v1187_v38 }
  0xb0   : > { %1257 = vmatpush2.msra.mxu0 %v1186_v41  ;;  %1931 = vmatpush2.msra.mxu1 %v1186_v41 }
  0xb1   : > { %1258 = vmatprep.subr.mxu0 %v1185_v43  ;;  %1900 = vmatprep.subr.mxu1 %v1185_v43 }
  0xb2   : > { %1259 = vmatpush2.msra.mxu0 %v1184_v45  ;;  %1932 = vmatpush2.msra.mxu1 %v1184_v45 }
  0xb3   : > { %1260 = vmatprep.subr.mxu0 %v1183_v48  ;;  %1901 = vmatprep.subr.mxu1 %v1183_v48 }
  0xb4   : > { %1261 = vmatpush2.msra.mxu0 %v1182_v51  ;;  %1933 = vmatpush2.msra.mxu1 %v1182_v51 }
  0xb5   : > { %1262 = vmatprep.subr.mxu0 %v1181_v54  ;;  %1902 = vmatprep.subr.mxu1 %v1181_v54 }
  0xb6   : > { %1263 = vmatpush2.msra.mxu0 %v1180_v57  ;;  %1934 = vmatpush2.msra.mxu1 %v1180_v57 }
  0xb7   : > { %1264 = vmatprep.subr.mxu0 %v1179_v60  ;;  %1903 = vmatprep.subr.mxu1 %v1179_v60 }
  0xb8   : > { %1265 = vmatpush2.msra.mxu0 %v1178_v3  ;;  %1935 = vmatpush2.msra.mxu1 %v1178_v3 }
  0xb9   : > { %1266 = vmatprep.subr.mxu0 %v1177_v6  ;;  %1904 = vmatprep.subr.mxu1 %v1177_v6 }
  0xdd   : > { %v391_v7 = vpop.xlane.xlu1 %390 }
  0xde   : > { %v484_v9 = vmul.f32 0.00390625, %v391_v7  ;;  %v388_v10 = vpop.xlane.xlu0 %387 }
  0xdf   : > { %v483_v12 = vmul.f32 0.00390625, %v388_v10 }
  0xe0   : > { %v516_v14 = vadd.f32 1e-05, %v484_v9  ;;  %v1176_v9 = vld [vmem:[%s2436_s7 + $0x110] sm:$0xff] }
  0xe1   : > { %v515_v16 = vadd.f32 1e-05, %v483_v12  ;;  %v439_v17 = vpop.xlane.xlu1 %438  ;;  %1267 = vmatpush2.msra.mxu0 %v1176_v9  ;;  %v1175_v12 = vld [vmem:[%s2436_s7 + $0x108] sm:$0xff]  ;;  %1936 = vmatpush2.msra.mxu1 %v1176_v9 }
  0xe2   : > { %2030 = vrsqrt.f32 %v516_v14  ;;  %v500_v19 = vmul.f32 0.00390625, %v439_v17  ;;  %v436_v20 = vpop.xlane.xlu0 %435  ;;  %1268 = vmatprep.subr.mxu0 %v1175_v12  ;;  %1905 = vmatprep.subr.mxu1 %v1175_v12 }
  0xe3   : > { %2032 = vrsqrt.f32 %v515_v16  ;;  %v499_v22 = vmul.f32 0.00390625, %v436_v20  ;;  %v1174_v16 = vld [vmem:[%s2436_s7 + $0x100] sm:$0xff] }
  0xe4   : > { %v532_v24 = vadd.f32 1e-05, %v500_v19  ;;  %1269 = vmatpush2.msra.mxu0 %v1174_v16  ;;  %1937 = vmatpush2.msra.mxu1 %v1174_v16 }
  0xe5   : > { %v531_v26 = vadd.f32 1e-05, %v499_v22  ;;  %v442_v27 = vpop.xlane.xlu1 %441 }
  0xe6   : > { %2034 = vrsqrt.f32 %v532_v24  ;;  %v501_v29 = vmul.f32 0.00390625, %v442_v27  ;;  %v394_v30 = vpop.xlane.xlu0 %393 }
  0xe7   : > { %2036 = vrsqrt.f32 %v531_v26  ;;  %v485_v32 = vmul.f32 0.00390625, %v394_v30 }
  0xe8   : > { %v533_v34 = vadd.f32 1e-05, %v501_v29 }
  0xe9   : > { %v445_v36 = vpop.xlane.xlu1 %444  ;;  %v517_v37 = vadd.f32 1e-05, %v485_v32 }
  0xea   : > { %2038 = vrsqrt.f32 %v533_v34  ;;  %v502_v39 = vmul.f32 0.00390625, %v445_v36  ;;  %v397_v40 = vpop.xlane.xlu0 %396 }
  0xeb   : > { %2040 = vrsqrt.f32 %v517_v37  ;;  %v486_v42 = vmul.f32 0.00390625, %v397_v40 }
  0xec   : > { %v534_v44 = vadd.f32 1e-05, %v502_v39 }
  0xed   : > { %v448_v46 = vpop.xlane.xlu1 %447  ;;  %v518_v47 = vadd.f32 1e-05, %v486_v42 }
  0xee   : > { %2042 = vrsqrt.f32 %v534_v44  ;;  %v503_v49 = vmul.f32 0.00390625, %v448_v46  ;;  %v400_v50 = vpop.xlane.xlu0 %399 }
  0xef   : > { %v2031_v52 = vpop.eup %2030  ;;  %2044 = vrsqrt.f32 %v518_v47  ;;  %v487_v53 = vmul.f32 0.00390625, %v400_v50 }
  0xf0   : > { %v2033_v55 = vpop.eup %2032  ;;  %581 = vst.msk [vmem:[#allocation3 + $0x8] sm:$0xff] %vm579_vm0, %v2031_v52  ;;  %v535_v56 = vadd.f32 1e-05, %v503_v49 }
  0xf1   : > { %580 = vst.msk [vmem:[#allocation3] sm:$0xff] %vm579_vm0, %v2033_v55  ;;  %v451_v58 = vpop.xlane.xlu1 %450  ;;  %v519_v59 = vadd.f32 1e-05, %v487_v53 }
  0xf2   : > { %2046 = vrsqrt.f32 %v535_v56  ;;  %v504_v61 = vmul.f32 0.00390625, %v451_v58  ;;  %v403_v62 = vpop.xlane.xlu0 %402 }
  0xf3   : > { %v2035_v63 = vpop.eup %2034  ;;  %2048 = vrsqrt.f32 %v519_v59  ;;  %v488_v0 = vmul.f32 0.00390625, %v403_v62 }
  0xf4   : > { %v2037_v1 = vpop.eup %2036  ;;  %597 = vst.msk [vmem:[#allocation3 + $0x88] sm:$0xff] %vm579_vm0, %v2035_v63  ;;  %v536_v2 = vadd.f32 1e-05, %v504_v61 }
  0xf5   : > { %596 = vst.msk [vmem:[#allocation3 + $0x80] sm:$0xff] %vm579_vm0, %v2037_v1  ;;  %v454_v4 = vpop.xlane.xlu1 %453  ;;  %v520_v5 = vadd.f32 1e-05, %v488_v0 }
  0xf6   : > { %2050 = vrsqrt.f32 %v536_v2  ;;  %v505_v7 = vmul.f32 0.00390625, %v454_v4  ;;  %v406_v8 = vpop.xlane.xlu0 %405 }
  0xf7   : > { %v2039_v10 = vpop.eup %2038  ;;  %2052 = vrsqrt.f32 %v520_v5  ;;  %v489_v11 = vmul.f32 0.00390625, %v406_v8  ;;  %v748_v29 = vld [vmem:[#allocation3 + $0x8] sm:$0xff] }
  0xf8   : > { %v2041_v13 = vpop.eup %2040  ;;  %598 = vst.msk [vmem:[#allocation3 + $0x90] sm:$0xff] %vm579_vm0, %v2039_v10  ;;  %v537_v14 = vadd.f32 1e-05, %v505_v7  ;;  %v747_v15 = vld [vmem:[#allocation3] sm:$0xff] }
  0xf9   : > { %582 = vst.msk [vmem:[#allocation3 + $0x10] sm:$0xff] %vm579_vm0, %v2041_v13  ;;  %781 = vperm.xlu0 %2028, %v747_v15   ;;  %v457_v17 = vpop.xlane.xlu1 %456  ;;  %v521_v18 = vadd.f32 1e-05, %v489_v11 }
  0xfa   : > { %2054 = vrsqrt.f32 %v537_v14  ;;  %v506_v19 = vmul.f32 0.00390625, %v457_v17  ;;  %v409_v20 = vpop.xlane.xlu0 %408 }
  0xfb   : > { %v2043_v21 = vpop.eup %2042  ;;  %2056 = vrsqrt.f32 %v521_v18  ;;  %v490_v22 = vmul.f32 0.00390625, %v409_v20  ;;  %v764_v38 = vld [vmem:[#allocation3 + $0x88] sm:$0xff] }
  0xfc   : > { %v2045_v23 = vpop.eup %2044  ;;  %599 = vst.msk [vmem:[#allocation3 + $0x98] sm:$0xff] %vm579_vm0, %v2043_v21  ;;  %v538_v24 = vadd.f32 1e-05, %v506_v19  ;;  %v763_v25 = vld [vmem:[#allocation3 + $0x80] sm:$0xff] }
  0xfd   : > { %583 = vst.msk [vmem:[#allocation3 + $0x18] sm:$0xff] %vm579_vm0, %v2045_v23  ;;  %861 = vperm.xlu1 %2029, %v763_v25   ;;  %v460_v26 = vpop.xlane.xlu1 %459  ;;  %v522_v27 = vadd.f32 1e-05, %v490_v22 }
  0xfe   : > { %2058 = vrsqrt.f32 %v538_v24  ;;  %v507_v28 = vmul.f32 0.00390625, %v460_v26  ;;  %v412_v30 = vpop.xlane.xlu0 %411 }
  0xff   : > { %v2047_v31 = vpop.eup %2046  ;;  %2060 = vrsqrt.f32 %v522_v27  ;;  %v491_v32 = vmul.f32 0.00390625, %v412_v30  ;;  %v765_v57 = vld [vmem:[#allocation3 + $0x90] sm:$0xff] }
 0x100   : > { %v2049_v33 = vpop.eup %2048  ;;  %600 = vst.msk [vmem:[#allocation3 + $0xa0] sm:$0xff] %vm579_vm0, %v2047_v31  ;;  %v539_v34 = vadd.f32 1e-05, %v507_v28  ;;  %v749_v47 = vld [vmem:[#allocation3 + $0x10] sm:$0xff] }
 0x101   : > { %584 = vst.msk [vmem:[#allocation3 + $0x20] sm:$0xff] %vm579_vm0, %v2049_v33  ;;  %786 = vperm.xlu1 %2029, %v748_v29   ;;  %v463_v35 = vpop.xlane.xlu1 %462  ;;  %v523_v36 = vadd.f32 1e-05, %v491_v32 }
 0x102   : > { %2062 = vrsqrt.f32 %v539_v34  ;;  %v508_v37 = vmul.f32 0.00390625, %v463_v35  ;;  %v415_v39 = vpop.xlane.xlu0 %414 }
 0x103   : > { %v2051_v40 = vpop.eup %2050  ;;  %2064 = vrsqrt.f32 %v523_v36  ;;  %v492_v41 = vmul.f32 0.00390625, %v415_v39  ;;  %v766_v13 = vld [vmem:[#allocation3 + $0x98] sm:$0xff] }
 0x104   : > { %v2053_v42 = vpop.eup %2052  ;;  %601 = vst.msk [vmem:[#allocation3 + $0xa8] sm:$0xff] %vm579_vm0, %v2051_v40  ;;  %v540_v43 = vadd.f32 1e-05, %v508_v37  ;;  %v750_v3 = vld [vmem:[#allocation3 + $0x18] sm:$0xff] }
 0x105   : > { %585 = vst.msk [vmem:[#allocation3 + $0x28] sm:$0xff] %vm579_vm0, %v2053_v42  ;;  %866 = vperm.xlu1 %2029, %v764_v38   ;;  %v466_v44 = vpop.xlane.xlu1 %465  ;;  %v524_v45 = vadd.f32 1e-05, %v492_v41 }
 0x106   : > { %2066 = vrsqrt.f32 %v540_v43  ;;  %v509_v46 = vmul.f32 0.00390625, %v466_v44  ;;  %v418_v48 = vpop.xlane.xlu0 %417 }
 0x107   : > { %v2055_v49 = vpop.eup %2054  ;;  %v767_v50 = vld [vmem:[#allocation3 + $0xa0] sm:$0xff]  ;;  %2068 = vrsqrt.f32 %v524_v45  ;;  %v493_v51 = vmul.f32 0.00390625, %v418_v48 }
 0x108   : > { %v2057_v52 = vpop.eup %2056  ;;  %602 = vst.msk [vmem:[#allocation3 + $0xb0] sm:$0xff] %vm579_vm0, %v2055_v49  ;;  %v541_v53 = vadd.f32 1e-05, %v509_v46  ;;  %881 = vperm.xlu0 %2028, %v767_v50   ;;  %v751_v23 = vld [vmem:[#allocation3 + $0x20] sm:$0xff] }
 0x109   : > { %586 = vst.msk [vmem:[#allocation3 + $0x30] sm:$0xff] %vm579_vm0, %v2057_v52  ;;  %791 = vperm.xlu1 %2029, %v749_v47   ;;  %v469_v54 = vpop.xlane.xlu1 %468  ;;  %v525_v55 = vadd.f32 1e-05, %v493_v51 }
 0x10a   : > { %2070 = vrsqrt.f32 %v541_v53  ;;  %v510_v56 = vmul.f32 0.00390625, %v469_v54  ;;  %v421_v58 = vpop.xlane.xlu0 %420 }
 0x10b   : > { %v2059_v59 = vpop.eup %2058  ;;  %v768_v60 = vld [vmem:[#allocation3 + $0xa8] sm:$0xff]  ;;  %2072 = vrsqrt.f32 %v525_v55  ;;  %v494_v61 = vmul.f32 0.00390625, %v421_v58 }
 0x10c   : > { %v2061_v62 = vpop.eup %2060  ;;  %603 = vst.msk [vmem:[#allocation3 + $0xb8] sm:$0xff] %vm579_vm0, %v2059_v59  ;;  %v542_v63 = vadd.f32 1e-05, %v510_v56  ;;  %886 = vperm.xlu0 %2028, %v768_v60   ;;  %v752_v33 = vld [vmem:[#allocation3 + $0x28] sm:$0xff] }
 0x10d   : > { %587 = vst.msk [vmem:[#allocation3 + $0x38] sm:$0xff] %vm579_vm0, %v2061_v62  ;;  %871 = vperm.xlu1 %2029, %v765_v57   ;;  %v472_v0 = vpop.xlane.xlu1 %471  ;;  %v526_v1 = vadd.f32 1e-05, %v494_v61 }
 0x10e   : > { %2074 = vrsqrt.f32 %v542_v63  ;;  %v511_v2 = vmul.f32 0.00390625, %v472_v0  ;;  %v424_v4 = vpop.xlane.xlu0 %423 }
 0x10f   : > { %v2063_v5 = vpop.eup %2062  ;;  %v769_v6 = vld [vmem:[#allocation3 + $0xb0] sm:$0xff]  ;;  %2076 = vrsqrt.f32 %v526_v1  ;;  %v495_v7 = vmul.f32 0.00390625, %v424_v4  ;;  %v1004_v1 = vlaneseq }
 0x110   : > { %v2065_v8 = vpop.eup %2064  ;;  %604 = vst.msk [vmem:[#allocation3 + $0xc0] sm:$0xff] %vm579_vm0, %v2063_v5  ;;  %v543_v9 = vadd.f32 1e-05, %v511_v2  ;;  %891 = vperm.xlu0 %2028, %v769_v6   ;;  %v753_v41 = vld [vmem:[#allocation3 + $0x30] sm:$0xff]  ;;  %v746_v5 = vld [vmem:[#allocation7] sm:$0x3] }
 0x111   : > { %588 = vst.msk [vmem:[#allocation3 + $0x40] sm:$0xff] %vm579_vm0, %v2065_v8  ;;  %796 = vperm.xlu1 %2029, %v750_v3   ;;  %v475_v10 = vpop.xlane.xlu1 %474  ;;  %v527_v11 = vadd.f32 1e-05, %v495_v7  ;;  %v1005_v2 = vshrl.u32 %v1004_v1, 7  ;;  %v681_v6 = vld [vmem:[#allocation4] sm:$0xff]  ;;  %v682_v7 = vld [vmem:[#allocation4 + $0x8] sm:$0xff] }
 0x112   : > { %2078 = vrsqrt.f32 %v543_v9  ;;  %v512_v12 = vmul.f32 0.00390625, %v475_v10  ;;  %v427_v14 = vpop.xlane.xlu0 %426  ;;  %v721_v1 = vld [vmem:[#allocation4 + $0x140] sm:$0xff] }
 0x113   : > { %v2067_v15 = vpop.eup %2066  ;;  %v770_v16 = vld [vmem:[#allocation3 + $0xb8] sm:$0xff]  ;;  %2080 = vrsqrt.f32 %v527_v11  ;;  %v496_v17 = vmul.f32 0.00390625, %v427_v14  ;;  %v1006_v3 = vsub.s32 0, %v1005_v2  ;;  %v1010_v4 = vsub.s32 1, %v1005_v2  ;;  %v714_v14 = vld [vmem:[#allocation4 + $0x108] sm:$0xff] }
 0x114   : > { %v2069_v18 = vpop.eup %2068  ;;  %605 = vst.msk [vmem:[#allocation3 + $0xc8] sm:$0xff] %vm579_vm0, %v2067_v15  ;;  %v544_v19 = vadd.f32 1e-05, %v512_v12  ;;  %896 = vperm.xlu0 %2028, %v770_v16   ;;  %v754_v45 = vld [vmem:[#allocation3 + $0x38] sm:$0xff] }
 0x115   : > { %589 = vst.msk [vmem:[#allocation3 + $0x48] sm:$0xff] %vm579_vm0, %v2069_v18  ;;  %876 = vperm.xlu1 %2029, %v766_v13   ;;  %v478_v20 = vpop.xlane.xlu1 %477  ;;  %v528_v21 = vadd.f32 1e-05, %v496_v17  ;;  %v2538_v8 = vrot.slane %v746_v5, %v1006_v3  ;;  %v2540_v9 = vrot.slane %v746_v5, %v1010_v4  ;;  %v713_v13 = vld [vmem:[#allocation4 + $0x100] sm:$0xff]  ;;  %v724_v5 = vld [vmem:[#allocation4 + $0x158] sm:$0xff] }
 0x116   : > { %2082 = vrsqrt.f32 %v544_v19  ;;  %v513_v22 = vmul.f32 0.00390625, %v478_v20  ;;  %v430_v24 = vpop.xlane.xlu0 %429  ;;  %v683_v20 = vld [vmem:[#allocation4 + $0x10] sm:$0xff] }
 0x117   : > { %v2071_v25 = vpop.eup %2070  ;;  %v771_v26 = vld [vmem:[#allocation3 + $0xc0] sm:$0xff]  ;;  %2084 = vrsqrt.f32 %v528_v21  ;;  %v497_v27 = vmul.f32 0.00390625, %v430_v24  ;;  %v684_v21 = vld [vmem:[#allocation4 + $0x18] sm:$0xff] }
 0x118   : > { %v2073_v28 = vpop.eup %2072  ;;  %606 = vst.msk [vmem:[#allocation3 + $0xd0] sm:$0xff] %vm579_vm0, %v2071_v25  ;;  %v545_v29 = vadd.f32 1e-05, %v513_v22  ;;  %901 = vperm.xlu0 %2028, %v771_v26   ;;  %v755_v49 = vld [vmem:[#allocation3 + $0x40] sm:$0xff] }
 0x119   : > { %590 = vst.msk [vmem:[#allocation3 + $0x50] sm:$0xff] %vm579_vm0, %v2073_v28  ;;  %801 = vperm.xlu1 %2029, %v751_v23   ;;  %v481_v30 = vpop.xlane.xlu1 %480  ;;  %v529_v31 = vadd.f32 1e-05, %v497_v27  ;;  %v715_v27 = vld [vmem:[#allocation4 + $0x110] sm:$0xff]  ;;  %v716_v28 = vld [vmem:[#allocation4 + $0x118] sm:$0xff] }
 0x11a   : > { %2086 = vrsqrt.f32 %v545_v29  ;;  %v514_v32 = vmul.f32 0.00390625, %v481_v30  ;;  %v433_v34 = vpop.xlane.xlu0 %432 }
 0x11b   : > { %v2075_v35 = vpop.eup %2074  ;;  %v772_v36 = vld [vmem:[#allocation3 + $0xc8] sm:$0xff]  ;;  %2088 = vrsqrt.f32 %v529_v31  ;;  %v498_v37 = vmul.f32 0.00390625, %v433_v34  ;;  %v685_v34 = vld [vmem:[#allocation4 + $0x20] sm:$0xff] }
 0x11c   : > { %v2077_v38 = vpop.eup %2076  ;;  %607 = vst.msk [vmem:[#allocation3 + $0xd8] sm:$0xff] %vm579_vm0, %v2075_v35  ;;  %v546_v39 = vadd.f32 1e-05, %v514_v32  ;;  %906 = vperm.xlu0 %2028, %v772_v36   ;;  %v756_v53 = vld [vmem:[#allocation3 + $0x48] sm:$0xff] }
 0x11d   : > { %591 = vst.msk [vmem:[#allocation3 + $0x58] sm:$0xff] %vm579_vm0, %v2077_v38  ;;  %806 = vperm.xlu1 %2029, %v752_v33   ;;  %v530_v40 = vadd.f32 1e-05, %v498_v37  ;;  %v686_v35 = vld [vmem:[#allocation4 + $0x28] sm:$0xff] }
 0x11e   : > { %2090 = vrsqrt.f32 %v546_v39 }
 0x11f   : > { %v2079_v42 = vpop.eup %2078  ;;  %v773_v43 = vld [vmem:[#allocation3 + $0xd0] sm:$0xff]  ;;  %2092 = vrsqrt.f32 %v530_v40 }
 0x120   : > { %v2081_v44 = vpop.eup %2080  ;;  %608 = vst.msk [vmem:[#allocation3 + $0xe0] sm:$0xff] %vm579_vm0, %v2079_v42  ;;  %911 = vperm.xlu0 %2028, %v773_v43   ;;  %v757_v57 = vld [vmem:[#allocation3 + $0x50] sm:$0xff]  ;;  %v717_v42 = vld [vmem:[#allocation4 + $0x120] sm:$0xff]  ;;  %v718_v43 = vld [vmem:[#allocation4 + $0x128] sm:$0xff] }
 0x121   : > { %592 = vst.msk [vmem:[#allocation3 + $0x60] sm:$0xff] %vm579_vm0, %v2081_v44  ;;  %811 = vperm.xlu1 %2029, %v753_v41  }
 0x123   : > { %v2083_v46 = vpop.eup %2082  ;;  %v774_v47 = vld [vmem:[#allocation3 + $0xd8] sm:$0xff] }
 0x124   : > { %v2085_v48 = vpop.eup %2084  ;;  %609 = vst.msk [vmem:[#allocation3 + $0xe8] sm:$0xff] %vm579_vm0, %v2083_v46  ;;  %916 = vperm.xlu0 %2028, %v774_v47   ;;  %v758_v59 = vld [vmem:[#allocation3 + $0x58] sm:$0xff] }
 0x125   : > { %593 = vst.msk [vmem:[#allocation3 + $0x68] sm:$0xff] %vm579_vm0, %v2085_v48  ;;  %816 = vperm.xlu1 %2029, %v754_v45  }
 0x127   : > { %v2087_v50 = vpop.eup %2086  ;;  %v775_v51 = vld [vmem:[#allocation3 + $0xe0] sm:$0xff] }
 0x128   : > { %v2089_v52 = vpop.eup %2088  ;;  %610 = vst.msk [vmem:[#allocation3 + $0xf0] sm:$0xff] %vm579_vm0, %v2087_v50  ;;  %921 = vperm.xlu0 %2028, %v775_v51   ;;  %v759_v61 = vld [vmem:[#allocation3 + $0x60] sm:$0xff]  ;;  %v687_v50 = vld [vmem:[#allocation4 + $0x30] sm:$0xff]  ;;  %v688_v51 = vld [vmem:[#allocation4 + $0x38] sm:$0xff] }
 0x129   : > { %594 = vst.msk [vmem:[#allocation3 + $0x70] sm:$0xff] %vm579_vm0, %v2089_v52  ;;  %821 = vperm.xlu1 %2029, %v755_v49  }
 0x12b   : > { %v2091_v54 = vpop.eup %2090  ;;  %v776_v55 = vld [vmem:[#allocation3 + $0xe8] sm:$0xff] }
 0x12c   : > { %v2093_v56 = vpop.eup %2092  ;;  %611 = vst.msk [vmem:[#allocation3 + $0xf8] sm:$0xff] %vm579_vm0, %v2091_v54  ;;  %926 = vperm.xlu0 %2028, %v776_v55   ;;  %v760_v62 = vld [vmem:[#allocation3 + $0x68] sm:$0xff] }
 0x12d   : > { %595 = vst.msk [vmem:[#allocation3 + $0x78] sm:$0xff] %vm579_vm0, %v2093_v56  ;;  %826 = vperm.xlu1 %2029, %v756_v53  }
 0x12f   : > { %v777_v58 = vld [vmem:[#allocation3 + $0xf0] sm:$0xff] }
 0x130   : > { %931 = vperm.xlu0 %2028, %v777_v58   ;;  %v761_v63 = vld [vmem:[#allocation3 + $0x70] sm:$0xff]  ;;  %v722_v58 = vld [vmem:[#allocation4 + $0x148] sm:$0xff] }
 0x131   : > { %831 = vperm.xlu1 %2029, %v757_v57  }
 0x133   : > { %v778_v60 = vld [vmem:[#allocation3 + $0xf8] sm:$0xff] }
 0x134   : > { %936 = vperm.xlu0 %2028, %v778_v60   ;;  %v762_v0 = vld [vmem:[#allocation3 + $0x78] sm:$0xff] }
 0x135   : > { %836 = vperm.xlu1 %2029, %v758_v59   ;;  %v719_v59 = vld [vmem:[#allocation4 + $0x130] sm:$0xff]  ;;  %v720_v60 = vld [vmem:[#allocation4 + $0x138] sm:$0xff] }
 0x139   : > { %841 = vperm.xlu1 %2029, %v759_v61  }
 0x13d   : > { %846 = vperm.xlu1 %2029, %v760_v62  }
 0x141   : > { %851 = vperm.xlu1 %2029, %v761_v63  }
 0x145   : > { %856 = vperm.xlu1 %2029, %v762_v0  }
 0x174   : > { %v782_v10 = vpop.permute.xlu0 %781 }
 0x175   : > { %v939_v11 = vmul.f32 %v782_v10, %v681_v6  ;;  %v940_v12 = vmul.f32 %v782_v10, %v682_v7  ;;  %v689_v6 = vld [vmem:[#allocation4 + $0x40] sm:$0xff]  ;;  %v690_v7 = vld [vmem:[#allocation4 + $0x48] sm:$0xff] }
 0x177   : > { %v1014_v15 = vmul.f32 %v2538_v8, %v939_v11  ;;  %v1015_v16 = vmul.f32 %v2540_v9, %v940_v12 }
 0x178   : > { %v862_v17 = vpop.permute.xlu1 %861 }
 0x179   : > { %v971_v18 = vmul.f32 %v862_v17, %v713_v13  ;;  %v972_v19 = vmul.f32 %v862_v17, %v714_v14  ;;  %1270 = vmatprep.mubr.f32.mxu0 %v1015_v16  ;;  %v723_v16 = vld [vmem:[#allocation4 + $0x150] sm:$0xff] }
 0x17a   : > { %1271 = vmatmul.mubr.f32.vlgmr.msra.gmra.mxu0 %v1014_v15 }
 0x17b   : > { %v1046_v22 = vmul.f32 %v2538_v8, %v971_v18  ;;  %v1047_v23 = vmul.f32 %v2540_v9, %v972_v19 }
 0x17c   : > { %v787_v24 = vpop.permute.xlu1 %786 }
 0x17d   : > { %v941_v25 = vmul.f32 %v787_v24, %v683_v20  ;;  %v942_v26 = vmul.f32 %v787_v24, %v684_v21  ;;  %1366 = vmatprep.mubr.f32.mxu1 %v1047_v23  ;;  %v726_v20 = vld [vmem:[#allocation4 + $0x168] sm:$0xff]  ;;  %v691_v21 = vld [vmem:[#allocation4 + $0x50] sm:$0xff] }
 0x17e   : > { %1367 = vmatmul.mubr.f32.vlgmr.msra.gmra.mxu1 %v1046_v22  ;;  %v692_v22 = vld [vmem:[#allocation4 + $0x58] sm:$0xff] }
 0x17f   : > { %v1016_v29 = vmul.f32 %v2538_v8, %v941_v25  ;;  %v1017_v30 = vmul.f32 %v2540_v9, %v942_v26 }
 0x180   : > { %v867_v31 = vpop.permute.xlu1 %866 }
 0x181   : > { %v973_v32 = vmul.f32 %v867_v31, %v715_v27  ;;  %v974_v33 = vmul.f32 %v867_v31, %v716_v28  ;;  %1276 = vmatprep.mubr.f32.mxu0 %v1017_v30  ;;  %v725_v30 = vld [vmem:[#allocation4 + $0x160] sm:$0xff] }
 0x182   : > { %1277 = vmatmul.mubr.f32.gmra.mxu0 %v1016_v29 }
 0x183   : > { %v1048_v36 = vmul.f32 %v2538_v8, %v973_v32  ;;  %v1049_v37 = vmul.f32 %v2540_v9, %v974_v33  ;;  %v882_v38 = vpop.permute.xlu0 %881 }
 0x184   : > { %v792_v39 = vpop.permute.xlu1 %791  ;;  %v980_v2 = vmul.f32 %v882_v38, %v722_v58  ;;  %v979_v13 = vmul.f32 %v882_v38, %v721_v1  ;;  %v698_v1 = vld [vmem:[#allocation4 + $0x88] sm:$0xff] }
 0x185   : > { %v943_v40 = vmul.f32 %v792_v39, %v685_v34  ;;  %v944_v41 = vmul.f32 %v792_v39, %v686_v35  ;;  %1372 = vmatprep.mubr.f32.mxu1 %v1049_v37  ;;  %v728_v34 = vld [vmem:[#allocation4 + $0x178] sm:$0xff]  ;;  %v693_v35 = vld [vmem:[#allocation4 + $0x60] sm:$0xff] }
 0x186   : > { %1373 = vmatmul.mubr.f32.gmra.mxu1 %v1048_v36  ;;  %v1055_v15 = vmul.f32 %v2540_v9, %v980_v2  ;;  %v1054_v26 = vmul.f32 %v2538_v8, %v979_v13  ;;  %v694_v36 = vld [vmem:[#allocation4 + $0x68] sm:$0xff] }
 0x187   : > { %v1018_v44 = vmul.f32 %v2538_v8, %v943_v40  ;;  %v1019_v45 = vmul.f32 %v2540_v9, %v944_v41  ;;  %v887_v46 = vpop.permute.xlu0 %886 }
 0x188   : > { %v872_v47 = vpop.permute.xlu1 %871  ;;  %v982_v17 = vmul.f32 %v887_v46, %v724_v5  ;;  %v981_v27 = vmul.f32 %v887_v46, %v723_v16  ;;  %v700_v16 = vld [vmem:[#allocation4 + $0x98] sm:$0xff] }
 0x189   : > { %v975_v48 = vmul.f32 %v872_v47, %v717_v42  ;;  %v976_v49 = vmul.f32 %v872_v47, %v718_v43  ;;  %1282 = vmatprep.mubr.f32.mxu0 %v1019_v45 }
 0x18a   : > { %1283 = vmatmul.mubr.f32.gmra.mxu0 %v1018_v44  ;;  %v1057_v29 = vmul.f32 %v2540_v9, %v982_v17  ;;  %v1056_v39 = vmul.f32 %v2538_v8, %v981_v27  ;;  %v727_v44 = vld [vmem:[#allocation4 + $0x170] sm:$0xff] }
 0x18b   : > { %v1050_v52 = vmul.f32 %v2538_v8, %v975_v48  ;;  %v1051_v53 = vmul.f32 %v2540_v9, %v976_v49  ;;  %v892_v54 = vpop.permute.xlu0 %891  ;;  %v730_v48 = vld [vmem:[#allocation4 + $0x188] sm:$0xff]  ;;  %v695_v49 = vld [vmem:[#allocation4 + $0x70] sm:$0xff] }
 0x18c   : > { %v797_v55 = vpop.permute.xlu1 %796  ;;  %v984_v31 = vmul.f32 %v892_v54, %v726_v20  ;;  %v983_v40 = vmul.f32 %v892_v54, %v725_v30  ;;  %v702_v30 = vld [vmem:[#allocation4 + $0xa8] sm:$0xff] }
 0x18d   : > { %v945_v56 = vmul.f32 %v797_v55, %v687_v50  ;;  %v946_v57 = vmul.f32 %v797_v55, %v688_v51  ;;  %1378 = vmatprep.mubr.f32.mxu1 %v1051_v53  ;;  %v696_v50 = vld [vmem:[#allocation4 + $0x78] sm:$0xff] }
 0x18e   : > { %1379 = vmatmul.mubr.f32.gmra.mxu1 %v1050_v52  ;;  %v1059_v43 = vmul.f32 %v2540_v9, %v984_v31  ;;  %v1058_v53 = vmul.f32 %v2538_v8, %v983_v40  ;;  %v738_v40 = vld [vmem:[#allocation4 + $0x1c8] sm:$0xff] }
 0x18f   : > { %v1020_v61 = vmul.f32 %v2538_v8, %v945_v56  ;;  %v1021_v62 = vmul.f32 %v2540_v9, %v946_v57  ;;  %v2556_v63 = vpop.permute.xlu0 %896  ;;  %v729_v57 = vld [vmem:[#allocation4 + $0x180] sm:$0xff] }
 0x190   : > { %v877_v0 = vpop.permute.xlu1 %876  ;;  %v986_v45 = vmul.f32 %v2556_v63, %v728_v34  ;;  %v985_v54 = vmul.f32 %v2556_v63, %v727_v44  ;;  %v704_v44 = vld [vmem:[#allocation4 + $0xb8] sm:$0xff] }
 0x191   : > { %v977_v3 = vmul.f32 %v877_v0, %v719_v59  ;;  %v978_v4 = vmul.f32 %v877_v0, %v720_v60  ;;  %1288 = vmatprep.mubr.f32.mxu0 %v1021_v62  ;;  %v697_v0 = vld [vmem:[#allocation4 + $0x80] sm:$0xff] }
 0x192   : > { %1289 = vmatmul.mubr.f32.gmra.mxu0 %v1020_v61  ;;  %v1061_v56 = vmul.f32 %v2540_v9, %v986_v45  ;;  %v732_v61 = vld [vmem:[#allocation4 + $0x198] sm:$0xff]  ;;  %v1060_v63 = vmul.f32 %v2538_v8, %v985_v54 }
 0x193   : > { %v1052_v10 = vmul.f32 %v2538_v8, %v977_v3  ;;  %v1053_v11 = vmul.f32 %v2540_v9, %v978_v4  ;;  %v2560_v12 = vpop.permute.xlu0 %901  ;;  %v740_v54 = vld [vmem:[#allocation4 + $0x1d8] sm:$0xff] }
 0x194   : > { %v802_v14 = vpop.permute.xlu1 %801  ;;  %v988_v58 = vmul.f32 %v2560_v12, %v730_v48  ;;  %v987_v4 = vmul.f32 %v2560_v12, %v729_v57 }
 0x195   : > { %v947_v18 = vmul.f32 %v802_v14, %v689_v6  ;;  %v948_v19 = vmul.f32 %v802_v14, %v690_v7  ;;  %1384 = vmatprep.mubr.f32.mxu1 %v1053_v11  ;;  %v731_v7 = vld [vmem:[#allocation4 + $0x190] sm:$0xff]  ;;  %v734_v14 = vld [vmem:[#allocation4 + $0x1a8] sm:$0xff] }
 0x196   : > { %1385 = vmatmul.mubr.f32.gmra.mxu1 %v1052_v10  ;;  %v1063_v6 = vmul.f32 %v2540_v9, %v988_v58  ;;  %v1062_v12 = vmul.f32 %v2538_v8, %v987_v4  ;;  %v742_v4 = vld [vmem:[#allocation4 + $0x1e8] sm:$0xff] }
 0x197   : > { %v1022_v23 = vmul.f32 %v2538_v8, %v947_v18  ;;  %v1023_v24 = vmul.f32 %v2540_v9, %v948_v19  ;;  %1390 = vmatprep.mubr.f32.mxu1 %v1055_v15  ;;  %v2565_v25 = vpop.permute.xlu0 %906  ;;  %v699_v15 = vld [vmem:[#allocation4 + $0x90] sm:$0xff] }
 0x198   : > { %v807_v28 = vpop.permute.xlu1 %806  ;;  %v990_v10 = vmul.f32 %v2565_v25, %v732_v61  ;;  %v989_v19 = vmul.f32 %v2565_v25, %v731_v7 }
 0x199   : > { %v949_v32 = vmul.f32 %v807_v28, %v691_v21  ;;  %v950_v33 = vmul.f32 %v807_v28, %v692_v22  ;;  %1294 = vmatprep.mubr.f32.mxu0 %v1023_v24  ;;  %v736_v28 = vld [vmem:[#allocation4 + $0x1b8] sm:$0xff] }
 0x19a   : > { %1295 = vmatmul.mubr.f32.gmra.mxu0 %v1022_v23  ;;  %1391 = vmatmul.mubr.f32.gmra.mxu1 %v1054_v26  ;;  %v1065_v22 = vmul.f32 %v2540_v9, %v990_v10  ;;  %v733_v23 = vld [vmem:[#allocation4 + $0x1a0] sm:$0xff]  ;;  %v1064_v25 = vmul.f32 %v2538_v8, %v989_v19  ;;  %v744_v19 = vld [vmem:[#allocation4 + $0x1f8] sm:$0xff] }
 0x19b   : > { %v1024_v37 = vmul.f32 %v2538_v8, %v949_v32  ;;  %v1025_v38 = vmul.f32 %v2540_v9, %v950_v33  ;;  %1396 = vmatprep.mubr.f32.mxu1 %v1057_v29  ;;  %v2572_v42 = vpop.permute.xlu0 %911  ;;  %v701_v29 = vld [vmem:[#allocation4 + $0xa0] sm:$0xff] }
 0x19c   : > { %v812_v41 = vpop.permute.xlu1 %811  ;;  %v992_v24 = vmul.f32 %v2572_v42, %v734_v14  ;;  %v991_v33 = vmul.f32 %v2572_v42, %v733_v23 }
 0x19d   : > { %v951_v46 = vmul.f32 %v812_v41, %v693_v35  ;;  %v952_v47 = vmul.f32 %v812_v41, %v694_v36  ;;  %1300 = vmatprep.mubr.f32.mxu0 %v1025_v38  ;;  %v735_v36 = vld [vmem:[#allocation4 + $0x1b0] sm:$0xff] }
 0x19e   : > { %1301 = vmatmul.mubr.f32.gmra.mxu0 %v1024_v37  ;;  %1397 = vmatmul.mubr.f32.gmra.mxu1 %v1056_v39  ;;  %v1067_v35 = vmul.f32 %v2540_v9, %v992_v24  ;;  %v1066_v42 = vmul.f32 %v2538_v8, %v991_v33  ;;  %v711_v33 = vld [vmem:[#allocation4 + $0xf0] sm:$0xff] }
 0x19f   : > { %v1026_v51 = vmul.f32 %v2538_v8, %v951_v46  ;;  %v1027_v52 = vmul.f32 %v2540_v9, %v952_v47  ;;  %1402 = vmatprep.mubr.f32.mxu1 %v1059_v43  ;;  %v917_v62 = vpop.permute.xlu0 %916  ;;  %v703_v43 = vld [vmem:[#allocation4 + $0xb0] sm:$0xff] }
 0x1a0   : > { %v817_v55 = vpop.permute.xlu1 %816  ;;  %v994_v37 = vmul.f32 %v917_v62, %v736_v28  ;;  %v993_v47 = vmul.f32 %v917_v62, %v735_v36 }
 0x1a1   : > { %v953_v59 = vmul.f32 %v817_v55, %v695_v49  ;;  %v954_v60 = vmul.f32 %v817_v55, %v696_v50  ;;  %1306 = vmatprep.mubr.f32.mxu0 %v1027_v52  ;;  %v737_v50 = vld [vmem:[#allocation4 + $0x1c0] sm:$0xff] }
 0x1a2   : > { %1307 = vmatmul.mubr.f32.gmra.mxu0 %v1026_v51  ;;  %1403 = vmatmul.mubr.f32.gmra.mxu1 %v1058_v53  ;;  %v1069_v49 = vmul.f32 %v2540_v9, %v994_v37  ;;  %v705_v55 = vld [vmem:[#allocation4 + $0xc0] sm:$0xff] }
 0x1a3   : > { %v1028_v2 = vmul.f32 %v2538_v8, %v953_v59  ;;  %v1029_v3 = vmul.f32 %v2540_v9, %v954_v60  ;;  %1408 = vmatprep.mubr.f32.mxu1 %v1061_v56  ;;  %v922_v20 = vpop.permute.xlu0 %921  ;;  %v706_v56 = vld [vmem:[#allocation4 + $0xc8] sm:$0xff]  ;;  %v1068_v59 = vmul.f32 %v2538_v8, %v993_v47 }
 0x1a4   : > { %v822_v5 = vpop.permute.xlu1 %821  ;;  %v996_v51 = vmul.f32 %v922_v20, %v738_v40  ;;  %v995_v60 = vmul.f32 %v922_v20, %v737_v50 }
 0x1a5   : > { %v955_v11 = vmul.f32 %v822_v5, %v697_v0  ;;  %v956_v13 = vmul.f32 %v822_v5, %v698_v1  ;;  %1312 = vmatprep.mubr.f32.mxu0 %v1029_v3  ;;  %v739_v1 = vld [vmem:[#allocation4 + $0x1d0] sm:$0xff] }
 0x1a6   : > { %1313 = vmatmul.mubr.f32.gmra.mxu0 %v1028_v2  ;;  %1409 = vmatmul.mubr.f32.gmra.mxu1 %v1060_v63  ;;  %v1071_v0 = vmul.f32 %v2540_v9, %v996_v51  ;;  %v707_v5 = vld [vmem:[#allocation4 + $0xd0] sm:$0xff] }
 0x1a7   : > { %v1030_v17 = vmul.f32 %v2538_v8, %v955_v11  ;;  %v1031_v18 = vmul.f32 %v2540_v9, %v956_v13  ;;  %1414 = vmatprep.mubr.f32.mxu1 %v1063_v6  ;;  %v927_v41 = vpop.permute.xlu0 %926  ;;  %v708_v6 = vld [vmem:[#allocation4 + $0xd8] sm:$0xff]  ;;  %v1070_v11 = vmul.f32 %v2538_v8, %v995_v60 }
 0x1a8   : > { %v827_v21 = vpop.permute.xlu1 %826  ;;  %v998_v2 = vmul.f32 %v927_v41, %v740_v54  ;;  %v997_v13 = vmul.f32 %v927_v41, %v739_v1 }
 0x1a9   : > { %v957_v26 = vmul.f32 %v827_v21, %v699_v15  ;;  %v958_v27 = vmul.f32 %v827_v21, %v700_v16  ;;  %1318 = vmatprep.mubr.f32.mxu0 %v1031_v18  ;;  %v741_v16 = vld [vmem:[#allocation4 + $0x1e0] sm:$0xff] }
 0x1aa   : > { %1319 = vmatmul.mubr.f32.gmra.mxu0 %v1030_v17  ;;  %1415 = vmatmul.mubr.f32.gmra.mxu1 %v1062_v12  ;;  %v1073_v15 = vmul.f32 %v2540_v9, %v998_v2  ;;  %v709_v21 = vld [vmem:[#allocation4 + $0xe0] sm:$0xff] }
 0x1ab   : > { %v1032_v31 = vmul.f32 %v2538_v8, %v957_v26  ;;  %v1033_v32 = vmul.f32 %v2540_v9, %v958_v27  ;;  %1420 = vmatprep.mubr.f32.mxu1 %v1065_v22  ;;  %v932_v61 = vpop.permute.xlu0 %931  ;;  %v710_v22 = vld [vmem:[#allocation4 + $0xe8] sm:$0xff]  ;;  %v1072_v26 = vmul.f32 %v2538_v8, %v997_v13 }
 0x1ac   : > { %v832_v34 = vpop.permute.xlu1 %831  ;;  %v1000_v17 = vmul.f32 %v932_v61, %v742_v4  ;;  %v999_v27 = vmul.f32 %v932_v61, %v741_v16 }
 0x1ad   : > { %v959_v38 = vmul.f32 %v832_v34, %v701_v29  ;;  %v960_v39 = vmul.f32 %v832_v34, %v702_v30  ;;  %1324 = vmatprep.mubr.f32.mxu0 %v1033_v32  ;;  %v743_v30 = vld [vmem:[#allocation4 + $0x1f0] sm:$0xff]  ;;  %v712_v34 = vld [vmem:[#allocation4 + $0xf8] sm:$0xff] }
 0x1ae   : > { %1325 = vmatmul.mubr.f32.gmra.mxu0 %v1032_v31  ;;  %1421 = vmatmul.mubr.f32.gmra.mxu1 %v1064_v25  ;;  %v1075_v29 = vmul.f32 %v2540_v9, %v1000_v17  ;;  %v1074_v37 = vmul.f32 %v2538_v8, %v999_v27 }
 0x1af   : > { %v1034_v45 = vmul.f32 %v2538_v8, %v959_v38  ;;  %v1035_v46 = vmul.f32 %v2540_v9, %v960_v39  ;;  %1426 = vmatprep.mubr.f32.mxu1 %v1067_v35  ;;  %v937_v20 = vpop.permute.xlu0 %936 }
 0x1b0   : > { %v837_v48 = vpop.permute.xlu1 %836  ;;  %v1002_v31 = vmul.f32 %v937_v20, %v744_v19  ;;  %v1001_v38 = vmul.f32 %v937_v20, %v743_v30 }
 0x1b1   : > { %v961_v52 = vmul.f32 %v837_v48, %v703_v43  ;;  %v962_v53 = vmul.f32 %v837_v48, %v704_v44  ;;  %1330 = vmatprep.mubr.f32.mxu0 %v1035_v46 }
 0x1b2   : > { %1331 = vmatmul.mubr.f32.gmra.mxu0 %v1034_v45  ;;  %1427 = vmatmul.mubr.f32.gmra.mxu1 %v1066_v42  ;;  %v1077_v40 = vmul.f32 %v2540_v9, %v1002_v31  ;;  %v1076_v46 = vmul.f32 %v2538_v8, %v1001_v38 }
 0x1b3   : > { %v1036_v57 = vmul.f32 %v2538_v8, %v961_v52  ;;  %v1037_v58 = vmul.f32 %v2540_v9, %v962_v53  ;;  %1432 = vmatprep.mubr.f32.mxu1 %v1069_v49 }
 0x1b4   : > { %v842_v62 = vpop.permute.xlu1 %841 }
 0x1b5   : > { %v963_v3 = vmul.f32 %v842_v62, %v705_v55  ;;  %v964_v63 = vmul.f32 %v842_v62, %v706_v56  ;;  %1336 = vmatprep.mubr.f32.mxu0 %v1037_v58 }
 0x1b6   : > { %1337 = vmatmul.mubr.f32.gmra.mxu0 %v1036_v57  ;;  %1433 = vmatmul.mubr.f32.gmra.mxu1 %v1068_v59 }
 0x1b7   : > { %v1038_v7 = vmul.f32 %v2538_v8, %v963_v3  ;;  %v1039_v10 = vmul.f32 %v2540_v9, %v964_v63  ;;  %1438 = vmatprep.mubr.f32.mxu1 %v1071_v0 }
 0x1b8   : > { %v847_v14 = vpop.permute.xlu1 %846 }
 0x1b9   : > { %v965_v18 = vmul.f32 %v847_v14, %v707_v5  ;;  %v966_v12 = vmul.f32 %v847_v14, %v708_v6  ;;  %1342 = vmatprep.mubr.f32.mxu0 %v1039_v10 }
 0x1ba   : > { %1343 = vmatmul.mubr.f32.gmra.mxu0 %v1038_v7  ;;  %1439 = vmatmul.mubr.f32.gmra.mxu1 %v1070_v11 }
 0x1bb   : > { %v1040_v23 = vmul.f32 %v2538_v8, %v965_v18  ;;  %v1041_v24 = vmul.f32 %v2540_v9, %v966_v12  ;;  %1444 = vmatprep.mubr.f32.mxu1 %v1073_v15 }
 0x1bc   : > { %v852_v28 = vpop.permute.xlu1 %851 }
 0x1bd   : > { %v967_v32 = vmul.f32 %v852_v28, %v709_v21  ;;  %v968_v25 = vmul.f32 %v852_v28, %v710_v22  ;;  %1348 = vmatprep.mubr.f32.mxu0 %v1041_v24 }
 0x1be   : > { %1349 = vmatmul.mubr.f32.gmra.mxu0 %v1040_v23  ;;  %1445 = vmatmul.mubr.f32.gmra.mxu1 %v1072_v26 }
 0x1bf   : > { %v1042_v35 = vmul.f32 %v2538_v8, %v967_v32  ;;  %v1043_v36 = vmul.f32 %v2540_v9, %v968_v25  ;;  %1450 = vmatprep.mubr.f32.mxu1 %v1075_v29 }
 0x1c0   : > { %v857_v39 = vpop.permute.xlu1 %856 }
 0x1c1   : > { %v969_v41 = vmul.f32 %v857_v39, %v711_v33  ;;  %v970_v43 = vmul.f32 %v857_v39, %v712_v34  ;;  %1354 = vmatprep.mubr.f32.mxu0 %v1043_v36 }
 0x1c2   : > { %1355 = vmatmul.mubr.f32.gmra.mxu0 %v1042_v35  ;;  %1451 = vmatmul.mubr.f32.gmra.mxu1 %v1074_v37 }
 0x1c3   : > { %v1044_v44 = vmul.f32 %v2538_v8, %v969_v41  ;;  %v1045_v45 = vmul.f32 %v2540_v9, %v970_v43  ;;  %1456 = vmatprep.mubr.f32.mxu1 %v1077_v40 }
 0x1c5   : > { %1360 = vmatprep.mubr.f32.mxu0 %v1045_v45 }
 0x1c6   : > { %1361 = vmatmul.mubr.f32.gmra.mxu0 %v1044_v44  ;;  %1457 = vmatmul.mubr.f32.gmra.mxu1 %v1076_v46 }
 0x23a   : > { %v1272_v42 = vpop.f32.mrf.mxu0 }
 0x23b   : > { %1658 = vst [vmem:[%s2623_s18] sm:$0xff] %v1272_v42 }
 0x23c   : > { %v1274_v9 = vpop.f32.mrf.mxu0 }
 0x23d   : > { %1659 = vst [vmem:[%s2623_s18 + $0x8] sm:$0xff] %v1274_v9 }
 0x23e   : > { %v1368_v8 = vpop.f32.mrf.mxu1 }
 0x23f   : > { %1690 = vst [vmem:[%s2623_s18 + $0x100] sm:$0xff] %v1368_v8 }
 0x240   : > { %v1370_v47 = vpop.f32.mrf.mxu1 }
 0x241   : > { %1691 = vst [vmem:[%s2623_s18 + $0x108] sm:$0xff] %v1370_v47 }
 0x242   : > { %v1278_v48 = vpop.f32.mrf.mxu0 }
 0x243   : > { %1660 = vst [vmem:[%s2623_s18 + $0x10] sm:$0xff] %v1278_v48 }
 0x244   : > { %v1280_v49 = vpop.f32.mrf.mxu0 }
 0x245   : > { %1661 = vst [vmem:[%s2623_s18 + $0x18] sm:$0xff] %v1280_v49 }
 0x246   : > { %v1374_v50 = vpop.f32.mrf.mxu1 }
 0x247   : > { %1692 = vst [vmem:[%s2623_s18 + $0x110] sm:$0xff] %v1374_v50 }
 0x248   : > { %v1376_v51 = vpop.f32.mrf.mxu1 }
 0x249   : > { %1693 = vst [vmem:[%s2623_s18 + $0x118] sm:$0xff] %v1376_v51 }
 0x24a   : > { %v1284_v52 = vpop.f32.mrf.mxu0 }
 0x24b   : > { %1662 = vst [vmem:[%s2623_s18 + $0x20] sm:$0xff] %v1284_v52 }
 0x24c   : > { %v1286_v53 = vpop.f32.mrf.mxu0 }
 0x24d   : > { %1663 = vst [vmem:[%s2623_s18 + $0x28] sm:$0xff] %v1286_v53 }
 0x24e   : > { %v1380_v54 = vpop.f32.mrf.mxu1 }
 0x24f   : > { %1694 = vst [vmem:[%s2623_s18 + $0x120] sm:$0xff] %v1380_v54 }
 0x250   : > { %v1382_v55 = vpop.f32.mrf.mxu1 }
 0x251   : > { %1695 = vst [vmem:[%s2623_s18 + $0x128] sm:$0xff] %v1382_v55 }
 0x252   : > { %v1290_v56 = vpop.f32.mrf.mxu0 }
 0x253   : > { %1664 = vst [vmem:[%s2623_s18 + $0x30] sm:$0xff] %v1290_v56 }
 0x254   : > { %v1292_v57 = vpop.f32.mrf.mxu0 }
 0x255   : > { %1665 = vst [vmem:[%s2623_s18 + $0x38] sm:$0xff] %v1292_v57 }
 0x256   : > { %v1386_v58 = vpop.f32.mrf.mxu1 }
 0x257   : > { %1696 = vst [vmem:[%s2623_s18 + $0x130] sm:$0xff] %v1386_v58 }
 0x258   : > { %v1388_v59 = vpop.f32.mrf.mxu1 }
 0x259   : > { %1697 = vst [vmem:[%s2623_s18 + $0x138] sm:$0xff] %v1388_v59 }
 0x25a   : > { %v1296_v60 = vpop.f32.mrf.mxu0  ;;  %v1392_v61 = vpop.f32.mrf.mxu1 }
 0x25b   : > { %1666 = vst [vmem:[%s2623_s18 + $0x40] sm:$0xff] %v1296_v60  ;;  %1698 = vst [vmem:[%s2623_s18 + $0x140] sm:$0xff] %v1392_v61 }
 0x25c   : > { %v1298_v62 = vpop.f32.mrf.mxu0  ;;  %v1394_v0 = vpop.f32.mrf.mxu1 }
 0x25d   : > { %1667 = vst [vmem:[%s2623_s18 + $0x48] sm:$0xff] %v1298_v62  ;;  %1699 = vst [vmem:[%s2623_s18 + $0x148] sm:$0xff] %v1394_v0 }
 0x25e   : > { %v1302_v1 = vpop.f32.mrf.mxu0  ;;  %v1398_v2 = vpop.f32.mrf.mxu1 }
 0x25f   : > { %1668 = vst [vmem:[%s2623_s18 + $0x50] sm:$0xff] %v1302_v1  ;;  %1700 = vst [vmem:[%s2623_s18 + $0x150] sm:$0xff] %v1398_v2 }
 0x260   : > { %v1304_v3 = vpop.f32.mrf.mxu0  ;;  %v1400_v63 = vpop.f32.mrf.mxu1 }
 0x261   : > { %1669 = vst [vmem:[%s2623_s18 + $0x58] sm:$0xff] %v1304_v3  ;;  %1701 = vst [vmem:[%s2623_s18 + $0x158] sm:$0xff] %v1400_v63 }
 0x262   : > { %v1308_v4 = vpop.f32.mrf.mxu0  ;;  %v1404_v5 = vpop.f32.mrf.mxu1 }
 0x263   : > { %1670 = vst [vmem:[%s2623_s18 + $0x60] sm:$0xff] %v1308_v4  ;;  %1702 = vst [vmem:[%s2623_s18 + $0x160] sm:$0xff] %v1404_v5 }
 0x264   : > { %v1310_v6 = vpop.f32.mrf.mxu0  ;;  %v1406_v7 = vpop.f32.mrf.mxu1 }
 0x265   : > { %1671 = vst [vmem:[%s2623_s18 + $0x68] sm:$0xff] %v1310_v6  ;;  %1703 = vst [vmem:[%s2623_s18 + $0x168] sm:$0xff] %v1406_v7 }
 0x266   : > { %v1314_v10 = vpop.f32.mrf.mxu0  ;;  %v1410_v11 = vpop.f32.mrf.mxu1 }
 0x267   : > { %1672 = vst [vmem:[%s2623_s18 + $0x70] sm:$0xff] %v1314_v10  ;;  %1704 = vst [vmem:[%s2623_s18 + $0x170] sm:$0xff] %v1410_v11 }
 0x268   : > { %v1316_v13 = vpop.f32.mrf.mxu0  ;;  %v1412_v14 = vpop.f32.mrf.mxu1 }
 0x269   : > { %1673 = vst [vmem:[%s2623_s18 + $0x78] sm:$0xff] %v1316_v13  ;;  %1705 = vst [vmem:[%s2623_s18 + $0x178] sm:$0xff] %v1412_v14 }
 0x26a   : > { %v1320_v15 = vpop.f32.mrf.mxu0  ;;  %v1416_v16 = vpop.f32.mrf.mxu1 }
 0x26b   : > { %1674 = vst [vmem:[%s2623_s18 + $0x80] sm:$0xff] %v1320_v15  ;;  %1706 = vst [vmem:[%s2623_s18 + $0x180] sm:$0xff] %v1416_v16 }
 0x26c   : > { %v1322_v17 = vpop.f32.mrf.mxu0  ;;  %v1418_v18 = vpop.f32.mrf.mxu1 }
 0x26d   : > { %1675 = vst [vmem:[%s2623_s18 + $0x88] sm:$0xff] %v1322_v17  ;;  %1707 = vst [vmem:[%s2623_s18 + $0x188] sm:$0xff] %v1418_v18 }
 0x26e   : > { %v1326_v12 = vpop.f32.mrf.mxu0  ;;  %v1422_v19 = vpop.f32.mrf.mxu1 }
 0x26f   : > { %1676 = vst [vmem:[%s2623_s18 + $0x90] sm:$0xff] %v1326_v12  ;;  %1708 = vst [vmem:[%s2623_s18 + $0x190] sm:$0xff] %v1422_v19 }
 0x270   : > { %v1328_v20 = vpop.f32.mrf.mxu0  ;;  %v1424_v21 = vpop.f32.mrf.mxu1 }
 0x271   : > { %1677 = vst [vmem:[%s2623_s18 + $0x98] sm:$0xff] %v1328_v20  ;;  %1709 = vst [vmem:[%s2623_s18 + $0x198] sm:$0xff] %v1424_v21 }
 0x272   : > { %v1332_v22 = vpop.f32.mrf.mxu0  ;;  %v1428_v23 = vpop.f32.mrf.mxu1 }
 0x273   : > { %1678 = vst [vmem:[%s2623_s18 + $0xa0] sm:$0xff] %v1332_v22  ;;  %1710 = vst [vmem:[%s2623_s18 + $0x1a0] sm:$0xff] %v1428_v23 }
 0x274   : > { %v1334_v24 = vpop.f32.mrf.mxu0  ;;  %v1430_v26 = vpop.f32.mrf.mxu1 }
 0x275   : > { %1679 = vst [vmem:[%s2623_s18 + $0xa8] sm:$0xff] %v1334_v24  ;;  %1711 = vst [vmem:[%s2623_s18 + $0x1a8] sm:$0xff] %v1430_v26 }
 0x276   : > { %v1338_v27 = vpop.f32.mrf.mxu0  ;;  %v1434_v28 = vpop.f32.mrf.mxu1 }
 0x277   : > { %1680 = vst [vmem:[%s2623_s18 + $0xb0] sm:$0xff] %v1338_v27  ;;  %1712 = vst [vmem:[%s2623_s18 + $0x1b0] sm:$0xff] %v1434_v28 }
 0x278   : > { %v1340_v29 = vpop.f32.mrf.mxu0  ;;  %v1436_v30 = vpop.f32.mrf.mxu1 }
 0x279   : > { %1681 = vst [vmem:[%s2623_s18 + $0xb8] sm:$0xff] %v1340_v29  ;;  %1713 = vst [vmem:[%s2623_s18 + $0x1b8] sm:$0xff] %v1436_v30 }
 0x27a   : > { %v1344_v31 = vpop.f32.mrf.mxu0  ;;  %v1440_v32 = vpop.f32.mrf.mxu1 }
 0x27b   : > { %1682 = vst [vmem:[%s2623_s18 + $0xc0] sm:$0xff] %v1344_v31  ;;  %1714 = vst [vmem:[%s2623_s18 + $0x1c0] sm:$0xff] %v1440_v32 }
 0x27c   : > { %v1346_v25 = vpop.f32.mrf.mxu0  ;;  %v1442_v33 = vpop.f32.mrf.mxu1 }
 0x27d   : > { %1683 = vst [vmem:[%s2623_s18 + $0xc8] sm:$0xff] %v1346_v25  ;;  %1715 = vst [vmem:[%s2623_s18 + $0x1c8] sm:$0xff] %v1442_v33 }
 0x27e   : > { %v1350_v34 = vpop.f32.mrf.mxu0  ;;  %v1446_v35 = vpop.f32.mrf.mxu1 }
 0x27f   : > { %1684 = vst [vmem:[%s2623_s18 + $0xd0] sm:$0xff] %v1350_v34  ;;  %1716 = vst [vmem:[%s2623_s18 + $0x1d0] sm:$0xff] %v1446_v35 }
 0x280   : > { %v1352_v36 = vpop.f32.mrf.mxu0  ;;  %v1448_v37 = vpop.f32.mrf.mxu1 }
 0x281   : > { %1685 = vst [vmem:[%s2623_s18 + $0xd8] sm:$0xff] %v1352_v36  ;;  %1717 = vst [vmem:[%s2623_s18 + $0x1d8] sm:$0xff] %v1448_v37 }
 0x282   : > { %v1356_v38 = vpop.f32.mrf.mxu0  ;;  %v1452_v39 = vpop.f32.mrf.mxu1 }
 0x283   : > { %1686 = vst [vmem:[%s2623_s18 + $0xe0] sm:$0xff] %v1356_v38  ;;  %1718 = vst [vmem:[%s2623_s18 + $0x1e0] sm:$0xff] %v1452_v39 }
 0x284   : > { %v1358_v40 = vpop.f32.mrf.mxu0  ;;  %v1454_v41 = vpop.f32.mrf.mxu1 }
 0x285   : > { %1687 = vst [vmem:[%s2623_s18 + $0xe8] sm:$0xff] %v1358_v40  ;;  %1719 = vst [vmem:[%s2623_s18 + $0x1e8] sm:$0xff] %v1454_v41 }
 0x286   : > { %v1362_v43 = vpop.f32.mrf.mxu0  ;;  %v1458_v44 = vpop.f32.mrf.mxu1 }
 0x287   : > { %1688 = vst [vmem:[%s2623_s18 + $0xf0] sm:$0xff] %v1362_v43  ;;  %1720 = vst [vmem:[%s2623_s18 + $0x1f0] sm:$0xff] %v1458_v44 }
 0x288   : > { %v1364_v45 = vpop.f32.mrf.mxu0  ;;  %v1460_v46 = vpop.f32.mrf.mxu1 }
 0x289   : > { %1689 = vst [vmem:[%s2623_s18 + $0xf8] sm:$0xff] %v1364_v45  ;;  %1721 = vst [vmem:[%s2623_s18 + $0x1f8] sm:$0xff] %v1460_v46 }
 0x28a   : > { %2187 = shalt.err (!%p2184_p9)
}
 0x28b   : > { %s2188_s29 = scalar_lea.hbm %s2690_s10, 8192  ;;  %s2192_s0 = scalar_lea.hbm %s2748_s3, 24576 }
 0x28c   : > { %p2189_p8 = scmp.ne.s32.totalorder %s2690_s10, %s2188_s29  ;;  %p2193_p4 = scmp.lt.s32.totalorder %s2690_s10, %s2748_s3 }
 0x28d   : > { %p2194_p11 = scmp.lt.s32.totalorder %s2192_s0, %s2188_s29 }
 0x28e   : > { %p2190_p6 = pnand %p2189_p8, %p2768_p12 }
 0x28f   : > { %p2195_p1 = por %p2194_p11, %p2193_p4 }
 0x290   : > { %p2191_p10 = pneg %p2190_p6 }
 0x292   : > { %p2196_p7 = pnand %p2195_p1, %p2191_p10 }
 0x294   : > { %2199 = shalt.err (!%p2196_p7)
}
 0x295   : > { %s2272_s6 = smov 256   ;;  %s2273_s7 = smov 768  }
 0x296   : > { %s2274_s18 = smov 16  }
 0x297   : > { %1948 = dma.vmem_to_hbm [thread:$0]  (%p2768_p12), %s2692_s28, 8192, %s2690_s10, %s2700_s15, %s2272_s6, %s2273_s7, %s2274_s18  }
 0x298 PF: > { %p1970_p2 = scmp.ge.s32.totalorder %s2262_s17, 2  ;;  %s1754_s22 = sand.u32 1, %s2242_s12  }
 0x299   : > { %p2769_p13 = scmp.ne.s32.totalorder %s2757_s24, 0  ;;  %s1755_s8 = scalar_lea.sflag [#allocation6], %s1754_s22 }
 0x29b   : > { %p1962_p5 = pnand %p1970_p2, %p2769_p13 }
 0x29d   : > { %p1963_p0 = pneg %p1962_p5 }
 0x29f   : > { %2237 = dma.done.wait (%p1963_p0), %s1755_s8, 8192  }
 0x2a0   : > { %2239 = vsyncadd (%p1963_p0), %s1755_s8, 4294959104  ;;  %s18_s17 = sadd.s32 1, %s2262_s17   ;;  %s2770_s12 = smov %s2246_s13 }
 0x2a1   : > { %p15_p3 = scmp.ge.s32.totalorder %s18_s17, 5   ;;  %s2771_s13 = smov %s2250_s14 }
 0x2a2   : > { %s2772_s14 = smov %s2411_s30  ;;  %s2773_s15 = smov %s2258_s16 }
 0x2a3   : > { %s2774_s16 = smov %s2776_s21  ;;  %17 = sbr.rel (!%p15_p3) target bundleno = 8 (0x8), region = 95 }
 0x2a8   :  { %1760 = vsyncpa [#allocation5], 1 }
 0x2a9   :  { %1762 = vsyncpa [#allocation5 + $0x1], 1 }
 0x2aa   :  { %1763 = vsyncpa [#allocation8], 1 }
 0x2ab   :  { %1764 = vsyncpa [#allocation6], 1 }
 0x2ac   :  { %1766 = vsyncpa [#allocation6 + $0x1], 1 }

</bundles_post_ra>
